<compile_context>
chip_gen: v7x
topology: tpu7x:2x2x1
jax: 0.10.0
libtpu: 0.0.40
codegen_flags: <defaults>
</compile_context>

<pallas_src>
import numpy as np
import jax
import jax.numpy as jnp
from jax.experimental import pallas as pl
from jax.experimental.pallas import tpu as pltpu


# --------------------------------------------------------------------------- #
# Kernel                                                                       #
# --------------------------------------------------------------------------- #
def fourier_features_kernel(x_ref, b2_ref, phase_ref, o_ref):
    # x_ref:     (tn, 1)    raw input coordinates
    # b2_ref:    (1, tm2)   column tile of [B.T | B.T]
    # phase_ref: (1, tm2)   column tile of [0 .. 0 | pi/2 .. pi/2]
    # o_ref:     (tn, tm2)  output tile == [sin(2*pi*x*B) | cos(2*pi*x*B)]
    two_pi = jnp.float32(2.0 * np.pi)
    # Same op order as torch.matmul(2*pi*x, B.T): scale x first, then outer-product.
    x_proj = (two_pi * x_ref[...]) * b2_ref[...] + phase_ref[...]   # (tn, tm2), VPU
    o_ref[...] = jnp.sin(x_proj).astype(o_ref.dtype)                # one full-width store


# --------------------------------------------------------------------------- #
# Tiling / VMEM policy                                                         #
# --------------------------------------------------------------------------- #
def _vmem_policy():
    """(target output block bytes, scoped vmem limit) per TPU generation."""
    kind = ""
    try:
        kind = jax.devices()[0].device_kind.lower()
    except Exception:
        pass
    if ("v5" in kind) or ("v6" in kind):
        # 128 MiB physical VMEM: big blocks, generous scoped limit.
        return 8 * 2**20, 96 * 2**20
    # v7x (64 MiB physical) and unknown / interpret: conservative.
    return 4 * 2**20, 48 * 2**20


def _choose_tiles(n, two_m, target_block_bytes):
    """Pick (tn, tm2) so the f32 output block is ~target_block_bytes."""
    itemsize = 4  # compute in f32
    # Column (lane) tile: keep the full 2M width unless even an 8-row slab
    # would exceed the block target (very large M); then tile in 128-lane units.
    max_cols = max(128, ((target_block_bytes // (8 * itemsize)) // 128) * 128)
    tm2 = two_m if two_m <= max_cols else max_cols
    # Row tile: fill the block target, multiple of 8 sublanes.
    tn = max(8, ((target_block_bytes // (tm2 * itemsize)) // 8) * 8)
    # v7x megacore: the N axis is the parallel axis; keep >= 2 grid steps
    # whenever there are enough rows to split across both TensorCores.
    if n >= 16:
        tn = min(tn, ((pl.cdiv(n, 2) + 7) // 8) * 8)
    # Never exceed the (8-rounded) problem size.
    tn = min(tn, ((n + 7) // 8) * 8)
    return tn, tm2


# --------------------------------------------------------------------------- #
# Wrapper                                                                      #
# --------------------------------------------------------------------------- #
def fourier_features(x, B, *, out_dtype=jnp.float32, tn=None, tm2=None):
    """x: (N, 1) float32, B: (M, 1) float32 -> (N, 2*M) out_dtype."""
    N, one = x.shape
    assert one == 1, "FourierFeatures expects x of shape (N, 1)"
    M = B.shape[0]
    two_m = 2 * M

    x = x.astype(jnp.float32)
    b_row = B.reshape(1, M).astype(jnp.float32)
    # Duplicated B row + phase row -> fused sin/cos as a single sin.
    b2 = jnp.concatenate([b_row, b_row], axis=1)                       # (1, 2M)
    phase = jnp.concatenate(
        [jnp.zeros((1, M), jnp.float32),
         jnp.full((1, M), np.float32(np.pi / 2.0), jnp.float32)], axis=1)  # (1, 2M)

    target_block_bytes, vmem_limit = _vmem_policy()
    auto_tn, auto_tm2 = _choose_tiles(N, two_m, target_block_bytes)
    tn = auto_tn if tn is None else max(8, (tn // 8) * 8)
    tm2 = auto_tm2 if tm2 is None else tm2

    grid = (pl.cdiv(N, tn), pl.cdiv(two_m, tm2))

    out_bytes = np.dtype(out_dtype).itemsize
    cost = pl.CostEstimate(
        flops=4 * N * M,                    # outer-product mul + phase add
        transcendentals=2 * N * M,          # one sin per output element
        bytes_accessed=N * two_m * out_bytes + N * 4 + 2 * two_m * 4,
    )

    return pl.pallas_call(
        fourier_features_kernel,
        out_shape=jax.ShapeDtypeStruct((N, two_m), out_dtype),
        grid_spec=pltpu.PrefetchScalarGridSpec(
            num_scalar_prefetch=0,
            grid=grid,
            in_specs=[
                pl.BlockSpec((tn, 1), lambda i, j: (i, 0)),    # x row tile
                pl.BlockSpec((1, tm2), lambda i, j: (0, j)),   # [B|B] column tile
                pl.BlockSpec((1, tm2), lambda i, j: (0, j)),   # phase column tile
            ],
            out_specs=pl.BlockSpec((tn, tm2), lambda i, j: (i, j)),
        ),
        compiler_params=pltpu.CompilerParams(
            dimension_semantics=("parallel", "parallel"),      # megacore-shard rows (v7x)
            vmem_limit_bytes=vmem_limit,
        ),
        cost_estimate=cost,
    )(x, b2, phase)


# --------------------------------------------------------------------------- #
# Reference & demo                                                             #
# --------------------------------------------------------------------------- #
def fourier_features_reference_f64(x, B):
    """float64 NumPy reference of the PyTorch forward pass."""
    x64 = np.asarray(x, dtype=np.float64)
    B64 = np.asarray(B, dtype=np.float64)
    x_proj = 2.0 * np.pi * x64 @ B64.T
    return np.concatenate([np.sin(x_proj), np.cos(x_proj)], axis=-1)


if __name__ == "__main__":
    key = jax.random.PRNGKey(0)

    def run_case(case_key, n, mapping_size, scale, atol):
        k_b, k_x = jax.random.split(case_key)
        # Parameter init matches torch.randn((M, 1)) * scale in spirit.
        B = scale * jax.random.normal(k_b, (mapping_size, 1), dtype=jnp.float32)
        x = jax.random.normal(k_x, (n, 1), dtype=jnp.float32)

        out = jax.block_until_ready(fourier_features(x, B))
        assert out.shape == (n, 2 * mapping_size)

        ref = fourier_features_reference_f64(x, B)
        # Tolerances are set by f32 trig accuracy at the argument magnitude:
        # abs error ~ |arg| * eps_f32 from rounding the argument (plus the
        # rounding of the +pi/2 phase for the cos half).  This matches PyTorch
        # f32 semantics; it is not a kernel defect.
        np.testing.assert_allclose(np.asarray(out, np.float64), ref,
                                   rtol=0.0, atol=atol)

    # Case 1: moderate arguments (|arg| ~ O(10)) -> tight tolerance.
    #   N=136 (not a multiple of the row tile) exercises the masked partial block.
    run_case(jax.random.fold_in(key, 1), n=136, mapping_size=64, scale=0.5, atol=1e-4)

    # Case 2: original scale=10 -> |arg| up to O(500); f32 argument rounding
    #   alone contributes ~1e-4 absolute error, so use a trig-appropriate tolerance.
    run_case(jax.random.fold_in(key, 2), n=200, mapping_size=128, scale=10.0, atol=1e-3)

    print("KERNEL_OK")
</pallas_src>

<mosaic_0001>
module attributes {stable_mosaic.version = 11 : i64} {
  func.func @fourier_features_kernel(%arg0: i32, %arg1: i32, %arg2: memref<72x1xf32, #tpu.memory_space<vmem>>, %arg3: memref<1x128xf32, #tpu.memory_space<vmem>>, %arg4: memref<1x128xf32, #tpu.memory_space<vmem>>, %arg5: memref<72x128xf32, #tpu.memory_space<vmem>>) attributes {dimension_semantics = [#tpu.dimension_semantics<parallel>, #tpu.dimension_semantics<parallel>], iteration_bounds = array<i64: 2, 1>, scalar_prefetch = 0 : i64, scratch_operands = 0 : i64, tpu.core_type = #tpu.core_type<tc>, window_params = [{transform_indices = @transform_0, window_bounds = array<i64: 72, 1>}, {transform_indices = @transform_1, window_bounds = array<i64: 1, 128>}, {transform_indices = @transform_2, window_bounds = array<i64: 1, 128>}, {transform_indices = @transform_3, window_bounds = array<i64: 72, 128>}]} {
    %c0 = arith.constant 0 : index
    %c0_0 = arith.constant 0 : index
    %0 = vector.load %arg2[%c0, %c0_0] : memref<72x1xf32, #tpu.memory_space<vmem>>, vector<72x1xf32>
    %cst = arith.constant 6.28318548 : f32
    %1 = vector.broadcast %cst : f32 to vector<72x1xf32>
    %2 = arith.mulf %1, %0 : vector<72x1xf32>
    %c0_1 = arith.constant 0 : index
    %c0_2 = arith.constant 0 : index
    %3 = vector.load %arg3[%c0_1, %c0_2] : memref<1x128xf32, #tpu.memory_space<vmem>>, vector<1x128xf32>
    %4 = vector.broadcast %2 : vector<72x1xf32> to vector<72x128xf32>
    %5 = vector.broadcast %3 : vector<1x128xf32> to vector<72x128xf32>
    %6 = arith.mulf %4, %5 : vector<72x128xf32>
    %c0_3 = arith.constant 0 : index
    %c0_4 = arith.constant 0 : index
    %7 = vector.load %arg4[%c0_3, %c0_4] : memref<1x128xf32, #tpu.memory_space<vmem>>, vector<1x128xf32>
    %8 = vector.broadcast %7 : vector<1x128xf32> to vector<72x128xf32>
    %9 = arith.addf %6, %8 : vector<72x128xf32>
    %10 = math.sin %9 : vector<72x128xf32>
    %c0_5 = arith.constant 0 : index
    %c0_6 = arith.constant 0 : index
    %11 = vector.load %arg5[%c0_5, %c0_6] : memref<72x128xf32, #tpu.memory_space<vmem>>, vector<72x128xf32>
    tpu.vector_store %arg5[%c0_5, %c0_6], %10 {strides = array<i32>} : memref<72x128xf32, #tpu.memory_space<vmem>>, vector<72x128xf32>,
    return
  }
  func.func @transform_0(%arg0: i32, %arg1: i32) -> (i32, i32) {
    %c0_i32 = arith.constant 0 : i32
    %c0_i32_0 = arith.constant 0 : i32
    return %arg0, %c0_i32 : i32, i32
  }
  func.func @transform_1(%arg0: i32, %arg1: i32) -> (i32, i32) {
    %c0_i32 = arith.constant 0 : i32
    %c0_i32_0 = arith.constant 0 : i32
    return %c0_i32, %arg1 : i32, i32
  }
  func.func @transform_2(%arg0: i32, %arg1: i32) -> (i32, i32) {
    %c0_i32 = arith.constant 0 : i32
    %c0_i32_0 = arith.constant 0 : i32
    return %c0_i32, %arg1 : i32, i32
  }
  func.func @transform_3(%arg0: i32, %arg1: i32) -> (i32, i32) {
    %c0_i32 = arith.constant 0 : i32
    return %arg0, %arg1 : i32, i32
  }
}

</mosaic_0001>

<bundles_post_ra>
// kernel: tpu_custom_call.1
= control target key start
LH: loop header
LB: loop body
LE: loop exit
PB: predicated region body
PF: predicated region fallthrough
CT: control target
= control target key end

     0   :  { %8 = vsyncpa [#allocation3], 0  ;;  %s2540_s0 = inlined_call_operand.vmem [shape: f32[136,1], index: 0, kind: input, shape index: {}]   ;;  %s2541_s1 = inlined_call_operand.vmem [shape: f32[1,128], index: 1, kind: input, shape index: {}]   ;;  %s2542_s2 = inlined_call_operand.vmem [shape: f32[1,128], index: 2, kind: input, shape index: {}]   ;;  %s2543_s3 = inlined_call_operand.hbm [shape: f32[136,128], index: 3, kind: output, shape index: {}]  }
   0x1   :  { %10 = vsyncpa [#allocation3 + $0x1], 0  ;;  %s1699_s12 = smov 0   ;;  %s1701_s13 = smov 0  }
   0x2   :  { %s1703_s14 = smov 0   ;;  %s1705_s15 = smov 0  }
   0x3   :  { %s1707_s16 = smov 0   ;;  %s1709_s17 = smov 0  }
   0x4 LB: > { %s1395_s18 = sadd.s32 4294967295, %s1667_s17   ;;  %s1396_s19 = sadd.s32 4294967294, %s1667_s17   ;;  %s1667_s17 = sphi %s1709_s17, %s16_s17   ;;  %s1663_s16 = sphi %s1707_s16, %s2564_s16   ;;  %s1659_s15 = sphi %s1705_s15, %s2563_s15   ;;  %s1655_s14 = sphi %s1703_s14, %s2562_s14   ;;  %s1651_s13 = sphi %s1701_s13, %s2561_s13   ;;  %s1647_s12 = sphi %s1699_s12, %s2560_s12  }
   0x5   : > { %s28_s20 = sadd.s32 1, %s1663_s16  ;;  %s115_s21 = sadd.s32 1, %s1655_s14 }
   0x6   : > { %p30_p0 = scmp.ge.s32.totalorder %s28_s20, 2  ;;  %p125_p1 = scmp.ne.s32.totalorder %s1655_s14, %s1651_s13 }
   0x7   : > { %p126_p2 = scmp.eq.s32.totalorder %s1395_s18, 1  ;;  %p131_p3 = scmp.ne.s32.totalorder %s1651_s13, %s1647_s12 }
   0x8   : > { %s2566_s20 = smov (%p30_p0, %s28_s20), 0  ;;  %p132_p5 = scmp.eq.s32.totalorder %s1396_s19, 1 }
   0x9   : > { %p1739_p4 = por %p126_p2, %p125_p1  ;;  %s110_s23 = ssub.s32 %s1663_s16, %s2566_s20 }
   0xa   : > { %p1401_p6 = scmp.ge.s32.totalorder %s1667_s17, 1  ;;  %p113_p7 = scmp.eq.s32.totalorder %s110_s23, 0 }
   0xb   : > { %p1746_p8 = por %p132_p5, %p131_p3  ;;  %p179_p9 = scmp.lt.s32.totalorder %s1667_s17, 3 }
   0xc   : > { %s1752_s25 = scalar_select %p113_p7, %s1655_s14, %s115_s21  }
   0xd   : > { %p180_p10 = pnand %p1401_p6, %p179_p9 }
   0xe   : > { %s1755_s26 = smul.u32 (!%p180_p10), 9, %s1659_s15  ;;  %v1669_v0 = vmov (!%p180_p10), 0   ;;  %s210_s5 = sand.u32 (!%p180_p10), 1, %s1651_s13   ;;  %v1766_v19 = vld [vmem:[%s2541_s1] ss:$0 sm:$0xff] (!%p180_p10) }
   0xf   : > { %183 = sbr.rel (%p180_p10) target bundleno = 451 (0x1c3), region = 32  ;;  %1550 = vset.pattern.permute.xlu1 (!%p180_p10), %v1669_v0  ;;  %1549 = vset.pattern.permute.xlu0 (!%p180_p10), %v1669_v0  ;;  %v1771_v20 = vld [vmem:[%s2542_s2] ss:$0 sm:$0xff] (!%p180_p10)  ;;  %v1670_v57 = vmov (!%p180_p10), 683565275  }
  0x10   : > { %p218_p11 = scmp.lt.s32.totalorder (!%p180_p10), %s1755_s26, 16  ;;  %v1671_v59 = vmov (!%p180_p10), 2475754826   ;;  %v1672_v61 = vmov (!%p180_p10), 2131351028   ;;  %s2025_s10 = smul.u32 (!%p180_p10), 72, %s210_s5 }
  0x11   : > { %v1673_v63 = vmov (!%p180_p10), 2102212464  }
  0x12   : > { %s2061_s11 = scalar_lea.vmem (!%p180_p10), [#allocation2], %s2025_s10 }
  0x16   : > { %s219_s27 = scalar_select %p218_p11, %s1755_s26, 16 }
  0x18   : > { %s1402_s28 = sshll.u32 %s219_s27, 3  ;;  %s2474_s27 = scalar_lea.sflag [#allocation3], %s210_s5 }
  0x19   : > { %s221_s4 = scalar_lea.vmem %s2540_s0, %s1402_s28  ;;  %s1287_s28 = ssub.s32 (%p1739_p4), 17, %s1755_s26 }
  0x1a   : > { %v240_v1 = vld [vmem:[%s221_s4 + $0x10] sm:$0xff]  ;;  %v238_v2 = vld [vmem:[%s221_s4] sm:$0xff]  ;;  %v241_v3 = vld [vmem:[%s221_s4 + $0x18] sm:$0xff]  ;;  %p1288_p12 = scmp.lt.s32.totalorder (%p1739_p4), %s1287_s28, 9 }
  0x1b   : > { %v249_v4 = vmul.f32 6.2831855, %v240_v1  ;;  %v247_v5 = vmul.f32 6.2831855, %v238_v2  ;;  %v239_v6 = vld [vmem:[%s221_s4 + $0x8] sm:$0xff]  ;;  %v242_v10 = vld [vmem:[%s221_s4 + $0x20] sm:$0xff] }
  0x1c   : > { %v250_v7 = vmul.f32 6.2831855, %v241_v3  ;;  %v248_v8 = vmul.f32 6.2831855, %v239_v6  ;;  %v243_v9 = vld [vmem:[%s221_s4 + $0x28] sm:$0xff]  ;;  %v245_v13 = vld [vmem:[%s221_s4 + $0x38] sm:$0xff] }
  0x1d   : > { %269 = vperm.xlu1 %1550, %v249_v4   ;;  %259 = vperm.xlu0 %1549, %v247_v5   ;;  %v252_v11 = vmul.f32 6.2831855, %v243_v9  ;;  %v251_v12 = vmul.f32 6.2831855, %v242_v10  ;;  %v244_v14 = vld [vmem:[%s221_s4 + $0x30] sm:$0xff]  ;;  %v246_v17 = vld [vmem:[%s221_s4 + $0x40] sm:$0xff] }
  0x1e   : > { %v254_v15 = vmul.f32 6.2831855, %v245_v13  ;;  %v253_v16 = vmul.f32 6.2831855, %v244_v14  ;;  %v255_v18 = vmul.f32 6.2831855, %v246_v17 }
  0x1f   : > { %v1674_v1 = vmov 920167782   ;;  %v1675_v10 = vmov 1326507024  }
  0x21   : > { %274 = vperm.xlu1 %1550, %v250_v7   ;;  %264 = vperm.xlu0 %1549, %v248_v8  }
  0x25   : > { %284 = vperm.xlu1 %1550, %v252_v11   ;;  %279 = vperm.xlu0 %1549, %v251_v12  }
  0x29   : > { %294 = vperm.xlu1 %1550, %v254_v15   ;;  %289 = vperm.xlu0 %1549, %v253_v16  }
  0x2d   : > { %299 = vperm.xlu0 %1549, %v255_v18  }
  0x9c   : > { %v270_v21 = vpop.permute.xlu1 %269  ;;  %v260_v22 = vpop.permute.xlu0 %259 }
  0x9d   : > { %v310_v23 = vmul.f32 %v1766_v19, %v270_v21  ;;  %v308_v24 = vmul.f32 %v1766_v19, %v260_v22 }
  0x9f   : > { %v1776_v25 = vadd.f32 %v1771_v20, %v310_v23  ;;  %v1779_v26 = vadd.f32 %v1771_v20, %v308_v24 }
  0xa0   : > { %v275_v27 = vpop.permute.xlu1 %274  ;;  %v265_v45 = vpop.permute.xlu0 %264 }
  0xa1   : > { %v541_v28 = vand.u32 2147483647, %v1776_v25  ;;  %v544_v29 = vand.u32 2139095040, %v1776_v25  ;;  %v333_v30 = vand.u32 2147483647, %v1779_v26  ;;  %v336_v31 = vand.u32 2139095040, %v1779_v26 }
  0xa2   : > { %v311_v34 = vmul.f32 %v1766_v19, %v275_v27  ;;  %v1797_v51 = vmul.f32 %v1766_v19, %v265_v45  ;;  %vm543_vm13 = vcmp.lt.s32.totalorder %v1776_v25, 0  ;;  %vm335_vm14 = vcmp.lt.s32.totalorder %v1779_v26, 0 }
  0xa3   : > { %v545_v32 = vshrl.u32 %v544_v29, 23  ;;  %v548_v33 = vand.u32 8388607, %v541_v28  ;;  %v337_v35 = vshrl.u32 %v336_v31, 23  ;;  %v340_v36 = vand.u32 8388607, %v333_v30 }
  0xa4   : > { %v1791_v38 = vadd.f32 %v1771_v20, %v311_v34 }
  0xa5   : > { %v1413_v37 = vadd.s32 4294967169, %v545_v32  ;;  %v1405_v39 = vadd.s32 4294967169, %v337_v35  ;;  %v549_v40 = vor.u32 8388608, %v548_v33  ;;  %v341_v42 = vor.u32 8388608, %v340_v36 }
  0xa6   : > { %v648_v44 = vand.u32 2139095040, %v1791_v38  ;;  %v645_v55 = vand.u32 2147483647, %v1791_v38 }
  0xa7   : > { %v551_v41 = vadd.s32 1, %v1413_v37  ;;  %v343_v43 = vadd.s32 1, %v1405_v39  ;;  %v1794_v49 = vshll.u32 %v549_v40, 8  ;;  %v1801_v54 = vshll.u32 %v341_v42, 8 }
  0xa8   : > { %v649_v47 = vshrl.u32 %v648_v44, 23 }
  0xa9   : > { %vm552_vm0 = vcmp.gt.s32.totalorder %v551_v41, 0  ;;  %vm344_vm1 = vcmp.gt.s32.totalorder %v343_v43, 0 }
  0xaa   : > { %v553_v46 = vsel %vm552_vm0, %v551_v41, 0  ;;  %v345_v50 = vsel %vm344_vm1, %v343_v43, 0  ;;  %v1811_v4 = vadd.s32 4294967169, %v649_v47  ;;  %vm1918_vm1 = vcmp.le.f32.partialorder %v541_v28, 0.7853982 }
  0xab   : > { %v555_v48 = vand.u32 31, %v553_v46  ;;  %v554_v52 = vshrl.u32 %v553_v46, 5  ;;  %v1799_v53 = vand.u32 31, %v345_v50  ;;  %v1809_v3 = vshrl.u32 %v345_v50, 5 }
  0xad   : > { %v556_v56 = vsub.s32 32, %v555_v48  ;;  %v558_v58 = vshll.u32 %v1670_v57, %v555_v48  ;;  %v561_v60 = vshll.u32 %v1671_v59, %v555_v48  ;;  %v564_v62 = vshll.u32 %v1672_v61, %v555_v48 }
  0xae   : > { %v567_v0 = vshll.u32 %v1673_v63, %v555_v48  ;;  %v570_v2 = vshll.u32 %v1674_v1, %v555_v48  ;;  %vm573_vm2 = vcmp.lt.s32.totalorder %v554_v52, 1  ;;  %vm574_vm3 = vcmp.lt.s32.totalorder %v554_v52, 2 }
  0xaf   : > { %v557_v5 = vshrl.u32 %v1670_v57, %v556_v56  ;;  %v559_v6 = vshrl.u32 %v1671_v59, %v556_v56  ;;  %v562_v7 = vshrl.u32 %v1672_v61, %v556_v56  ;;  %v565_v8 = vshrl.u32 %v1673_v63, %v556_v56 }
  0xb0   : > { %v568_v9 = vshrl.u32 %v1674_v1, %v556_v56  ;;  %v571_v11 = vshrl.u32 %v1675_v10, %v556_v56  ;;  %v348_v15 = vsub.s32 32, %v1799_v53  ;;  %vm575_vm4 = vcmp.lt.s32.totalorder %v554_v52, 3 }
  0xb1   : > { %v560_v12 = vor.u32 %v559_v6, %v558_v58  ;;  %v563_v13 = vor.u32 %v562_v7, %v561_v60  ;;  %v566_v14 = vor.u32 %v565_v8, %v564_v62  ;;  %vm576_vm5 = vcmp.lt.s32.totalorder %v554_v52, 4 }
  0xb2   : > { %v569_v16 = vor.u32 %v568_v9, %v567_v0  ;;  %v572_v17 = vor.u32 %v571_v11, %v570_v2  ;;  %v350_v31 = vshll.u32 %v1670_v57, %v1799_v53  ;;  %v351_v34 = vshrl.u32 %v1671_v59, %v348_v15 }
  0xb3   : > { %v577_v18 = vsel %vm573_vm2, %v557_v5, %v560_v12  ;;  %v578_v21 = vsel %vm576_vm5, %v566_v14, 2102212464  ;;  %v581_v22 = vsel %vm573_vm2, %v560_v12, %v563_v13  ;;  %v585_v23 = vsel %vm573_vm2, %v563_v13, %v566_v14 }
  0xb4   : > { %v579_v24 = vsel %vm575_vm4, %v563_v13, %v578_v21  ;;  %v582_v27 = vsel %vm576_vm5, %v569_v16, 920167782  ;;  %v586_v29 = vsel %vm576_vm5, %v572_v17, 1326507024  ;;  %v353_v35 = vshll.u32 %v1671_v59, %v1799_v53 }
  0xb5   : > { %v583_v32 = vsel %vm575_vm4, %v566_v14, %v582_v27  ;;  %v587_v33 = vsel %vm575_vm4, %v569_v16, %v586_v29  ;;  %v580_v36 = vsel %vm574_vm3, %v577_v18, %v579_v24  ;;  %v354_v40 = vshrl.u32 %v1672_v61, %v348_v15 }
  0xb6   : > { %v584_v37 = vsel %vm574_vm3, %v581_v22, %v583_v32  ;;  %v588_v39 = vsel %vm574_vm3, %v585_v23, %v587_v33  ;;  %v352_v45 = vor.u32 %v351_v34, %v350_v31  ;;  %v356_v47 = vshll.u32 %v1672_v61, %v1799_v53 }
  0xb7   : > { %v1830_v41 = vmul.u32.u64.low %v1794_v49, %v588_v39  ;;  %v1831_v42 = vmul.u32.u64.high %v1794_v49, %v588_v39, %v1830_v41  ;;  %v1834_v43 = vmul.u32.u64.low %v1794_v49, %v584_v37  ;;  %v1835_v44 = vmul.u32.u64.high %v1794_v49, %v584_v37, %v1834_v43 }
  0xb8   : > { %v355_v46 = vor.u32 %v354_v40, %v353_v35  ;;  %v357_v48 = vshrl.u32 %v1673_v63, %v348_v15  ;;  %v349_v50 = vshrl.u32 %v1670_v57, %v348_v15  ;;  %v359_v52 = vshll.u32 %v1673_v63, %v1799_v53 }
  0xb9   : > { %v360_v56 = vshrl.u32 %v1674_v1, %v348_v15  ;;  %v363_v58 = vshrl.u32 %v1675_v10, %v348_v15  ;;  %v596_v60 = vmul.u32 %v1794_v49, %v580_v36  ;;  %v362_v0 = vshll.u32 %v1674_v1, %v1799_v53 }
  0xba   : > { %v358_v62 = vor.u32 %v357_v48, %v356_v47  ;;  %vm365_vm6 = vcmp.lt.s32.totalorder %v1809_v3, 1  ;;  %vm598_vm7 = vc.u32 %v1831_v42, %v1834_v43  ;;  %v599_v2 = vadd.s32 1, %v1835_v44 }
  0xbb   : > { %v361_v5 = vor.u32 %v360_v56, %v359_v52  ;;  %vm366_vm8 = vcmp.lt.s32.totalorder %v1809_v3, 2  ;;  %v364_v6 = vor.u32 %v363_v58, %v362_v0  ;;  %vm367_vm9 = vcmp.lt.s32.totalorder %v1809_v3, 3 }
  0xbc   : > { %vm368_vm10 = vcmp.lt.s32.totalorder %v1809_v3, 4  ;;  %v373_v7 = vsel %vm365_vm6, %v352_v45, %v355_v46  ;;  %v600_v49 = vsel %vm598_vm7, %v599_v2, %v1835_v44  ;;  %v377_v53 = vsel %vm365_vm6, %v355_v46, %v358_v62  ;;  %v285_v44 = vpop.permute.xlu1 %284 }
  0xbd   : > { %v370_v8 = vsel %vm368_vm10, %v358_v62, 2102212464  ;;  %v374_v9 = vsel %vm368_vm10, %v361_v5, 920167782  ;;  %v601_v11 = vadd.s32 %v600_v49, %v596_v60  ;;  %v369_v12 = vsel %vm365_vm6, %v349_v50, %v352_v45 }
  0xbe   : > { %v375_v13 = vsel %vm367_vm9, %v358_v62, %v374_v9  ;;  %v378_v14 = vsel %vm368_vm10, %v364_v6, 1326507024  ;;  %v371_v15 = vsel %vm367_vm9, %v355_v46, %v370_v8  ;;  %v655_v18 = vadd.s32 1, %v1811_v4 }
  0xbf   : > { %v376_v16 = vsel %vm366_vm8, %v373_v7, %v375_v13  ;;  %v379_v17 = vsel %vm367_vm9, %v361_v5, %v378_v14  ;;  %v602_v21 = vadd.s32 536870912, %v601_v11  ;;  %v652_v31 = vand.u32 8388607, %v645_v55 }
  0xc0   : > { %v380_v22 = vsel %vm366_vm8, %v377_v53, %v379_v17  ;;  %v1861_v23 = vmul.u32.u64.low %v1801_v54, %v376_v16  ;;  %v1862_v24 = vmul.u32.u64.high %v1801_v54, %v376_v16, %v1861_v23  ;;  %vm656_vm11 = vcmp.gt.s32.totalorder %v655_v18, 0 }
  0xc1   : > { %v1866_v27 = vmul.u32.u64.low %v1801_v54, %v380_v22  ;;  %v1867_v29 = vmul.u32.u64.high %v1801_v54, %v380_v22, %v1866_v27  ;;  %v603_v32 = vshrl.u32 %v602_v21, 30  ;;  %v372_v4 = vsel %vm366_vm8, %v369_v12, %v371_v15 }
  0xc2   : > { %v657_v33 = vsel %vm656_vm11, %v655_v18, 0  ;;  %v391_v36 = vadd.s32 1, %v1862_v24  ;;  %v1876_v37 = vadd.f32 %v1771_v20, %v1797_v51  ;;  %v388_v39 = vmul.u32 %v1801_v54, %v372_v4 }
  0xc3   : > { %v659_v34 = vand.u32 31, %v657_v33  ;;  %v604_v35 = vshll.u32 %v603_v32, 30  ;;  %vm390_vm12 = vc.u32 %v1867_v29, %v1861_v23  ;;  %v653_v40 = vor.u32 8388608, %v652_v31 }
  0xc4   : > { %v392_v3 = vsel %vm390_vm12, %v391_v36, %v1862_v24  ;;  %v597_v47 = vadd.s32 %v1834_v43, %v1831_v42  ;;  %v437_v48 = vand.u32 2147483647, %v1876_v37  ;;  %v1889_v54 = vmul.f32 %v1766_v19, %v285_v44 }
  0xc5   : > { %v660_v41 = vsub.s32 32, %v659_v34  ;;  %v1881_v45 = vsub.s32 %v601_v11, %v604_v35  ;;  %v393_v46 = vadd.s32 %v392_v3, %v388_v39  ;;  %v1892_v56 = vshll.u32 %v653_v40, 8 }
  0xc6   : > { %v440_v58 = vand.u32 2139095040, %v1876_v37  ;;  %v1896_v62 = vshrl.u32 %v657_v33, 5  ;;  %v627_v0 = vsub.s32 4, %v603_v32  ;;  %v662_v5 = vshll.u32 %v1670_v57, %v659_v34 }
  0xc7   : > { %v607_v51 = vsub.s32 0, %v1881_v45  ;;  %v394_v50 = vadd.s32 536870912, %v393_v46  ;;  %v663_v52 = vshrl.u32 %v1671_v59, %v660_v41  ;;  %v666_v42 = vshrl.u32 %v1672_v61, %v660_v41 }
  0xc8   : > { %v669_v43 = vshrl.u32 %v1673_v63, %v660_v41  ;;  %v672_v6 = vshrl.u32 %v1674_v1, %v660_v41  ;;  %v665_v49 = vshll.u32 %v1671_v59, %v659_v34  ;;  %v668_v8 = vshll.u32 %v1672_v61, %v659_v34 }
  0xc9   : > { %v1414_v60 = vmin.u32 %v607_v51, %v1881_v45  ;;  %v395_v2 = vshrl.u32 %v394_v50, 30  ;;  %v675_v9 = vshrl.u32 %v1675_v10, %v660_v41  ;;  %v664_v11 = vor.u32 %v663_v52, %v662_v5 }
  0xca   : > { %v671_v12 = vshll.u32 %v1673_v63, %v659_v34  ;;  %v441_v13 = vshrl.u32 %v440_v58, 23  ;;  %v667_v15 = vor.u32 %v666_v42, %v665_v49  ;;  %v670_v16 = vor.u32 %v669_v43, %v668_v8 }
  0xcb   : > { %v609_v7 = vclz %v1414_v60  ;;  %v396_v53 = vshll.u32 %v395_v2, 30  ;;  %v674_v17 = vshll.u32 %v1674_v1, %v659_v34  ;;  %v1909_v18 = vsel %vm543_vm13, %v627_v0, %v603_v32 }
  0xcc   : > { %v661_v22 = vshrl.u32 %v1670_v57, %v660_v41  ;;  %v673_v24 = vor.u32 %v672_v6, %v671_v12  ;;  %v419_v27 = vsub.s32 4, %v395_v2  ;;  %vm677_vm0 = vcmp.lt.s32.totalorder %v1896_v62, 1 }
  0xcd   : > { %v1415_v14 = vadd.s32 4294967294, %v609_v7  ;;  %v1912_v21 = vsub.s32 %v393_v46, %v396_v53  ;;  %v676_v31 = vor.u32 %v675_v9, %v674_v17  ;;  %vm679_vm2 = vcmp.lt.s32.totalorder %v1896_v62, 3 }
  0xce   : > { %vm680_vm3 = vcmp.lt.s32.totalorder %v1896_v62, 4  ;;  %vm1927_vm4 = vcmp.le.f32.partialorder %v333_v30, 0.7853982  ;;  %v685_v28 = vsel %vm677_vm0, %v664_v11, %v667_v15  ;;  %v689_v3 = vsel %vm677_vm0, %v667_v15, %v670_v16 }
  0xcf   : > { %vm1416_vm15 = vcmp.lt.s32.totalorder %v1415_v14, 0  ;;  %v399_v33 = vsub.s32 0, %v1912_v21  ;;  %v682_v39 = vsel %vm680_vm3, %v670_v16, 2102212464  ;;  %v686_v44 = vsel %vm680_vm3, %v673_v24, 920167782 }
  0xd0   : > { %v612_v32 = vsel %vm1416_vm15, 0, %v1415_v14  ;;  %v687_v30 = vsel %vm679_vm2, %v670_v16, %v686_v44  ;;  %v690_v50 = vsel %vm680_vm3, %v676_v31, 1326507024  ;;  %vm678_vm5 = vcmp.lt.s32.totalorder %v1896_v62, 2 }
  0xd1   : > { %v613_v34 = vsub.s32 32, %v612_v32  ;;  %v617_v35 = vsub.s32 4294967266, %v612_v32  ;;  %v614_v40 = vshll.u32 %v1881_v45, %v612_v32  ;;  %v1406_v41 = vmin.u32 %v399_v33, %v1912_v21 }
  0xd2   : > { %v681_v58 = vsel %vm677_vm0, %v661_v22, %v664_v11  ;;  %v683_v45 = vsel %vm679_vm2, %v667_v15, %v682_v39  ;;  %v688_v43 = vsel %vm678_vm5, %v685_v28, %v687_v30  ;;  %v420_v8 = vsel %vm335_vm14, %v419_v27, %v395_v2  ;;  %v280_v28 = vpop.permute.xlu0 %279 }
  0xd3   : > { %v615_v46 = vshrl.u32 %v597_v47, %v613_v34  ;;  %v618_v51 = vadd.s32 127, %v617_v35  ;;  %v401_v52 = vclz %v1406_v41  ;;  %v691_v47 = vsel %vm679_vm2, %v673_v24, %v690_v50 }
  0xd4   : > { %v692_v5 = vsel %vm678_vm5, %v689_v3, %v691_v47  ;;  %v1947_v6 = vmul.u32.u64.low %v1892_v56, %v688_v43  ;;  %v1948_v7 = vmul.u32.u64.high %v1892_v56, %v688_v43, %v1947_v6  ;;  %v389_v11 = vadd.s32 %v1861_v23, %v1867_v29 }
  0xd5   : > { %v616_v60 = vor.u32 %v615_v46, %v614_v40  ;;  %v619_v42 = vshll.u32 %v618_v51, 23  ;;  %v1407_v0 = vadd.s32 4294967294, %v401_v52  ;;  %v684_v62 = vsel %vm678_vm5, %v681_v58, %v683_v45 }
  0xd6   : > { %v1953_v9 = vmul.u32.u64.low %v1892_v56, %v692_v5  ;;  %v1954_v53 = vmul.u32.u64.high %v1892_v56, %v692_v5, %v1953_v9  ;;  %v1409_v12 = vadd.s32 4294967169, %v441_v13  ;;  %v630_v16 = vsel %vm1918_vm1, 0, %v1909_v18 }
  0xd7   : > { %v620_v49 = vor.u32 4788187, %v619_v42  ;;  %vm1408_vm6 = vcmp.lt.s32.totalorder %v1407_v0, 0  ;;  %v623_v15 = vcvt.s32.f32 %v616_v60  ;;  %v422_v2 = vsel %vm1927_vm4, 0, %v420_v8 }
  0xd8   : > { %v404_v17 = vsel %vm1408_vm6, 0, %v1407_v0  ;;  %v703_v27 = vadd.s32 1, %v1948_v7  ;;  %v700_v23 = vmul.u32 %v1892_v56, %v684_v62  ;;  %vm702_vm7 = vc.u32 %v1954_v53, %v1947_v6 }
  0xd9   : > { %v621_v14 = vand.u32 2147483647, %v620_v49  ;;  %v405_v22 = vsub.s32 32, %v404_v17  ;;  %v409_v24 = vsub.s32 4294967266, %v404_v17  ;;  %v447_v29 = vadd.s32 1, %v1409_v12 }
  0xda   : > { %v406_v13 = vshll.u32 %v1912_v21, %v404_v17  ;;  %v704_v18 = vsel %vm702_vm7, %v703_v27, %v1948_v7  ;;  %v634_v35 = vadd.s32 3, %v630_v16  ;;  %v426_v44 = vadd.s32 3, %v422_v2 }
  0xdb   : > { %v624_v31 = vmul.f32 %v623_v15, %v621_v14  ;;  %v407_v32 = vshrl.u32 %v389_v11, %v405_v22  ;;  %v410_v33 = vadd.s32 127, %v409_v24  ;;  %v705_v39 = vadd.s32 %v704_v18, %v700_v23 }
  0xdc   : > { %vm448_vm8 = vcmp.gt.s32.totalorder %v447_v29, 0  ;;  %v444_v21 = vand.u32 8388607, %v437_v48  ;;  %v1976_v52 = vmul.f32 %v1766_v19, %v280_v28  ;;  %v1978_v58 = vand.u32 3, %v634_v35 }
  0xdd   : > { %v625_v34 = vxor.u32 2147483648, %v624_v31  ;;  %v408_v40 = vor.u32 %v407_v32, %v406_v13  ;;  %v411_v41 = vshll.u32 %v410_v33, 23  ;;  %v449_v3 = vsel %vm448_vm8, %v447_v29, 0 }
  0xde   : > { %v706_v46 = vadd.s32 536870912, %v705_v39  ;;  %v451_v51 = vand.u32 31, %v449_v3  ;;  %vm647_vm9 = vcmp.lt.s32.totalorder %v1791_v38, 0  ;;  %v1981_v47 = vand.u32 3, %v426_v44 }
  0xdf   : > { %v626_v56 = vsel %vm543_vm13, %v625_v34, %v624_v31  ;;  %v412_v50 = vor.u32 4788187, %v411_v41  ;;  %v415_v43 = vcvt.s32.f32 %v408_v40  ;;  %v445_v5 = vor.u32 8388608, %v444_v21 }
  0xe0   : > { %v629_v30 = vsel %vm1918_vm1, %v1776_v25, %v626_v56  ;;  %v707_v45 = vshrl.u32 %v706_v46, 30  ;;  %v452_v60 = vsub.s32 32, %v451_v51  ;;  %v1986_v7 = vadd.f32 %v1771_v20, %v1889_v54 }
  0xe1   : > { %1551 = vcosq.f32 %v629_v30  ;;  %v413_v42 = vand.u32 2147483647, %v412_v50  ;;  %v1989_v8 = vadd.s32 %v1947_v6, %v1954_v53  ;;  %vm640_vm10 = vcmp.eq.s32.totalorder %v1978_v58, 2 }
  0xe2   : > { %1553 = vsinq.f32 %v629_v30  ;;  %v708_v0 = vshll.u32 %v707_v45, 30  ;;  %v455_v4 = vshrl.u32 %v1671_v59, %v452_v60  ;;  %v458_v9 = vshrl.u32 %v1672_v61, %v452_v60 }
  0xe3   : > { %v416_v49 = vmul.f32 %v415_v43, %v413_v42  ;;  %v461_v11 = vshrl.u32 %v1673_v63, %v452_v60  ;;  %v1996_v12 = vshrl.u32 %v449_v3, 5  ;;  %v454_v14 = vshll.u32 %v1670_v57, %v451_v51 }
  0xe4   : > { %v1994_v62 = vsub.s32 %v705_v39, %v708_v0  ;;  %v464_v15 = vshrl.u32 %v1674_v1, %v452_v60  ;;  %vm637_vm11 = vcmp.eq.s32.totalorder %v1978_v58, 0  ;;  %v731_v16 = vsub.s32 4, %v707_v45 }
  0xe5   : > { %v417_v54 = vxor.u32 2147483648, %v416_v49  ;;  %v457_v6 = vshll.u32 %v1671_v59, %v451_v51  ;;  %v460_v53 = vshll.u32 %v1672_v61, %v451_v51  ;;  %vm636_vm12 = vcmp.lt.s32.totalorder %v1978_v58, 2 }
  0xe6   : > { %v711_v17 = vsub.s32 0, %v1994_v62  ;;  %v456_v22 = vor.u32 %v455_v4, %v454_v14  ;;  %v463_v24 = vshll.u32 %v1673_v63, %v451_v51  ;;  %v2006_v2 = vshll.u32 %v445_v5, 8 }
  0xe7   : > { %vm633_vm13 = vweird.f32 %v1776_v25  ;;  %v418_v27 = vsel %vm335_vm14, %v417_v54, %v416_v49  ;;  %v459_v31 = vor.u32 %v458_v9, %v457_v6  ;;  %v462_v23 = vor.u32 %v461_v11, %v460_v53 }
  0xe8   : > { %v467_v29 = vshrl.u32 %v1675_v10, %v452_v60  ;;  %v421_v13 = vsel %vm1927_vm4, %v1779_v26, %v418_v27  ;;  %v1418_v32 = vmin.u32 %v711_v17, %v1994_v62  ;;  %v465_v33 = vor.u32 %v464_v15, %v463_v24 }
  0xe9   : > { %v466_v18 = vshll.u32 %v1674_v1, %v451_v51  ;;  %1555 = vcosq.f32 %v421_v13  ;;  %v2019_v34 = vsel %vm647_vm9, %v731_v16, %v707_v45  ;;  %v453_v35 = vshrl.u32 %v1670_v57, %v452_v60 }
  0xea   : > { %vm469_vm14 = vcmp.lt.s32.totalorder %v1996_v12, 1  ;;  %1557 = vsinq.f32 %v421_v13  ;;  %vm2029_vm15 = vcmp.le.f32.partialorder %v645_v55, 0.7853982  ;;  %v713_v28 = vclz %v1418_v32 }
  0xeb   : > { %v1552_v39 = vpop.eup %1551  ;;  %v468_v40 = vor.u32 %v467_v29, %v466_v18  ;;  %vm470_vm0 = vcmp.lt.s32.totalorder %v1996_v12, 2  ;;  %vm471_vm1 = vcmp.lt.s32.totalorder %v1996_v12, 3  ;;  %vm472_vm2 = vcmp.lt.s32.totalorder %v1996_v12, 4 }
  0xec   : > { %v1554_v41 = vpop.eup %1553  ;;  %v641_v44 = vxor.u32 2147483648, %v1552_v39  ;;  %v477_v3 = vsel %vm469_vm14, %v456_v22, %v459_v31  ;;  %v1419_v46 = vadd.s32 4294967294, %v713_v28  ;;  %v474_v21 = vsel %vm472_vm2, %v462_v23, 2102212464 }
  0xed   : > { %v638_v56 = vxor.u32 2147483648, %v1554_v41  ;;  %v478_v55 = vsel %vm472_vm2, %v465_v33, 920167782  ;;  %v473_v30 = vsel %vm469_vm14, %v453_v35, %v456_v22  ;;  %v481_v45 = vsel %vm469_vm14, %v459_v31, %v462_v23 }
  0xee   : > { %v642_v51 = vsel %vm640_vm10, %v641_v44, %v1554_v41  ;;  %v479_v50 = vsel %vm471_vm1, %v462_v23, %v478_v55  ;;  %vm1420_vm3 = vcmp.lt.s32.totalorder %v1419_v46, 0  ;;  %v482_v43 = vsel %vm472_vm2, %v468_v40, 1326507024 }
  0xef   : > { %v639_v60 = vsel %vm637_vm11, %v1552_v39, %v638_v56  ;;  %v480_v42 = vsel %vm470_vm0, %v477_v3, %v479_v50  ;;  %v716_v5 = vsel %vm1420_vm3, 0, %v1419_v46  ;;  %v475_v4 = vsel %vm471_vm1, %v459_v31, %v474_v21 }
  0xf0   : > { %v643_v0 = vsel %vm636_vm12, %v639_v60, %v642_v51  ;;  %v483_v49 = vsel %vm471_vm1, %v465_v33, %v482_v43  ;;  %vm425_vm4 = vweird.f32 %v1779_v26  ;;  %v717_v11 = vsub.s32 32, %v716_v5 }
  0xf1   : > { %v644_v9 = vsel %vm633_vm13, nan, %v643_v0  ;;  %v718_v14 = vshll.u32 %v1994_v62, %v716_v5  ;;  %v721_v15 = vsub.s32 4294967266, %v716_v5  ;;  %v484_v58 = vsel %vm470_vm0, %v481_v45, %v483_v49 }
  0xf2   : > { %1271 = vst [vmem:[%s2061_s11 + $0x10] sm:$0xff] %v644_v9  ;;  %v2067_v54 = vmul.u32.u64.low %v2006_v2, %v480_v42  ;;  %v2068_v16 = vmul.u32.u64.high %v2006_v2, %v480_v42, %v2067_v54  ;;  %v856_v25 = vand.u32 2139095040, %v1986_v7  ;;  %v719_v6 = vshrl.u32 %v1989_v8, %v717_v11 }
  0xf3   : > { %v722_v53 = vadd.s32 127, %v721_v15  ;;  %v2074_v62 = vmul.u32.u64.low %v2006_v2, %v484_v58  ;;  %v2075_v17 = vmul.u32.u64.high %v2006_v2, %v484_v58, %v2074_v62  ;;  %v1556_v22 = vpop.eup %1555  ;;  %vm428_vm5 = vcmp.lt.s32.totalorder %v1981_v47, 2 }
  0xf4   : > { %vm432_vm6 = vcmp.eq.s32.totalorder %v1981_v47, 2  ;;  %v734_v24 = vsel %vm2029_vm15, 0, %v2019_v34  ;;  %v857_v27 = vshrl.u32 %v856_v25, 23  ;;  %v1558_v31 = vpop.eup %1557  ;;  %v433_v23 = vxor.u32 2147483648, %v1556_v22 }
  0xf5   : > { %v720_v29 = vor.u32 %v719_v6, %v718_v14  ;;  %v723_v13 = vshll.u32 %v722_v53, 23  ;;  %v476_v8 = vsel %vm470_vm0, %v473_v30, %v475_v4  ;;  %v430_v32 = vxor.u32 2147483648, %v1558_v31 }
  0xf6   : > { %v495_v33 = vadd.s32 1, %v2068_v16  ;;  %v853_v18 = vand.u32 2147483647, %v1986_v7  ;;  %v1425_v35 = vadd.s32 4294967169, %v857_v27  ;;  %vm429_vm7 = vcmp.eq.s32.totalorder %v1981_v47, 0 }
  0xf7   : > { %v434_v39 = vsel %vm432_vm6, %v433_v23, %v1558_v31  ;;  %v724_v28 = vor.u32 4788187, %v723_v13  ;;  %v738_v34 = vadd.s32 3, %v734_v24  ;;  %v431_v40 = vsel %vm429_vm7, %v1556_v22, %v430_v32 }
  0xf8   : > { %v492_v41 = vmul.u32 %v2006_v2, %v476_v8  ;;  %vm494_vm8 = vc.u32 %v2075_v17, %v2067_v54  ;;  %v863_v12 = vadd.s32 1, %v1425_v35  ;;  %v435_v44 = vsel %vm428_vm5, %v431_v40, %v434_v39 }
  0xf9   : > { %v725_v3 = vand.u32 2147483647, %v724_v28  ;;  %v727_v56 = vcvt.s32.f32 %v720_v29  ;;  %v496_v46 = vsel %vm494_vm8, %v495_v33, %v2068_v16  ;;  %v436_v21 = vsel %vm425_vm4, nan, %v435_v44 }
  0xfa   : > { %v497_v55 = vadd.s32 %v496_v46, %v492_v41  ;;  %v860_v51 = vand.u32 8388607, %v853_v18  ;;  %vm864_vm10 = vcmp.gt.s32.totalorder %v863_v12, 0  ;;  %1269 = vst [vmem:[%s2061_s11] sm:$0xff] %v436_v21  ;;  %v2100_v50 = vadd.f32 %v1771_v20, %v1976_v52 }
  0xfb   : > { %v728_v2 = vmul.f32 %v727_v56, %v725_v3  ;;  %v865_v30 = vsel %vm864_vm10, %v863_v12, 0  ;;  %v2102_v42 = vand.u32 3, %v738_v34  ;;  %v493_v13 = vadd.s32 %v2067_v54, %v2075_v17 }
  0xfc   : > { %v498_v47 = vadd.s32 536870912, %v497_v55  ;;  %v867_v45 = vand.u32 31, %v865_v30  ;;  %v861_v26 = vor.u32 8388608, %v860_v51  ;;  %v2108_v4 = vshrl.u32 %v865_v30, 5 }
  0xfd   : > { %v729_v60 = vxor.u32 2147483648, %v728_v2  ;;  %v752_v9 = vand.u32 2139095040, %v2100_v50  ;;  %v749_v32 = vand.u32 2147483647, %v2100_v50  ;;  %vm741_vm11 = vcmp.eq.s32.totalorder %v2102_v42, 0 }
  0xfe   : > { %v2104_v43 = vshrl.u32 %v498_v47, 30  ;;  %v868_v0 = vsub.s32 32, %v867_v45  ;;  %v870_v49 = vshll.u32 %v1670_v57, %v867_v45  ;;  %v873_v14 = vshll.u32 %v1671_v59, %v867_v45 }
  0xff   : > { %v730_v5 = vsel %vm647_vm9, %v729_v60, %v728_v2  ;;  %v876_v15 = vshll.u32 %v1672_v61, %v867_v45  ;;  %v879_v53 = vshll.u32 %v1673_v63, %v867_v45  ;;  %v882_v24 = vshll.u32 %v1674_v1, %v867_v45 }
 0x100   : > { %v733_v52 = vsel %vm2029_vm15, %v1791_v38, %v730_v5  ;;  %v500_v11 = vshll.u32 %v2104_v43, 30  ;;  %v871_v58 = vshrl.u32 %v1671_v59, %v868_v0  ;;  %v874_v16 = vshrl.u32 %v1672_v61, %v868_v0 }
 0x101   : > { %1559 = vcosq.f32 %v733_v52  ;;  %v877_v25 = vshrl.u32 %v1673_v63, %v868_v0  ;;  %v880_v36 = vshrl.u32 %v1674_v1, %v868_v0  ;;  %v883_v29 = vshrl.u32 %v1675_v10, %v868_v0 }
 0x102   : > { %1561 = vsinq.f32 %v733_v52  ;;  %v2121_v6 = vsub.s32 %v497_v55, %v500_v11  ;;  %v872_v62 = vor.u32 %v871_v58, %v870_v49  ;;  %v875_v22 = vor.u32 %v874_v16, %v873_v14 }
 0x103   : > { %v878_v31 = vor.u32 %v877_v25, %v876_v15  ;;  %v881_v23 = vor.u32 %v880_v36, %v879_v53  ;;  %vm744_vm9 = vcmp.eq.s32.totalorder %v2102_v42, 2  ;;  %v2131_v8 = vshll.u32 %v861_v26, 8 }
 0x104   : > { %v503_v27 = vsub.s32 0, %v2121_v6  ;;  %v753_v33 = vshrl.u32 %v752_v9, 23  ;;  %vm439_vm12 = vcmp.lt.s32.totalorder %v1876_v37, 0  ;;  %v884_v39 = vor.u32 %v883_v29, %v882_v24 }
 0x105   : > { %vm885_vm13 = vcmp.lt.s32.totalorder %v2108_v4, 1  ;;  %vm888_vm14 = vcmp.lt.s32.totalorder %v2108_v4, 4  ;;  %vm740_vm15 = vcmp.lt.s32.totalorder %v2102_v42, 2  ;;  %v523_v54 = vsub.s32 4, %v2104_v43 }
 0x106   : > { %v1410_v35 = vmin.u32 %v503_v27, %v2121_v6  ;;  %v869_v17 = vshrl.u32 %v1670_v57, %v868_v0  ;;  %v893_v28 = vsel %vm885_vm13, %v872_v62, %v875_v22  ;;  %v894_v34 = vsel %vm888_vm14, %v881_v23, 920167782 }
 0x107   : > { %vm737_vm0 = vweird.f32 %v1791_v38  ;;  %vm887_vm1 = vcmp.lt.s32.totalorder %v2108_v4, 3  ;;  %v890_v41 = vsel %vm888_vm14, %v878_v31, 2102212464  ;;  %v897_v12 = vsel %vm885_vm13, %v875_v22, %v878_v31 }
 0x108   : > { %v505_v40 = vclz %v1410_v35  ;;  %vm886_vm2 = vcmp.lt.s32.totalorder %v2108_v4, 2  ;;  %v895_v44 = vsel %vm887_vm1, %v878_v31, %v894_v34  ;;  %v898_v3 = vsel %vm888_vm14, %v884_v39, 1326507024 }
 0x109   : > { %v1421_v56 = vadd.s32 4294967169, %v753_v33  ;;  %v889_v21 = vsel %vm885_vm13, %v869_v17, %v872_v62  ;;  %v896_v55 = vsel %vm886_vm2, %v893_v28, %v895_v44  ;;  %v899_v51 = vsel %vm887_vm1, %v881_v23, %v898_v3 }
 0x10a   : > { %v1411_v46 = vadd.s32 4294967294, %v505_v40  ;;  %v891_v30 = vsel %vm887_vm1, %v875_v22, %v890_v41  ;;  %v900_v47 = vsel %vm886_vm2, %v897_v12, %v899_v51  ;;  %v2166_v11 = vand.u32 8388607, %v749_v32 }
 0x10b   : > { %v1560_v2 = vpop.eup %1559  ;;  %v2156_v45 = vmul.u32.u64.low %v2131_v8, %v896_v55  ;;  %v2157_v60 = vmul.u32.u64.high %v2131_v8, %v896_v55, %v2156_v45  ;;  %v2161_v5 = vmul.u32.u64.low %v2131_v8, %v900_v47  ;;  %v2162_v49 = vmul.u32.u64.high %v2131_v8, %v900_v47, %v2161_v5 }
 0x10c   : > { %v1562_v26 = vpop.eup %1561  ;;  %v745_v0 = vxor.u32 2147483648, %v1560_v2  ;;  %vm1412_vm3 = vcmp.lt.s32.totalorder %v1411_v46, 0  ;;  %v759_v14 = vadd.s32 1, %v1421_v56  ;;  %v892_v25 = vsel %vm886_vm2, %v889_v21, %v891_v30  ;;  %v290_v56 = vpop.permute.xlu0 %289 }
 0x10d   : > { %v742_v9 = vxor.u32 2147483648, %v1562_v26  ;;  %v508_v52 = vsel %vm1412_vm3, 0, %v1411_v46  ;;  %v524_v36 = vsel %vm439_vm12, %v523_v54, %v2104_v43  ;;  %v911_v62 = vadd.s32 1, %v2157_v60  ;;  %v295_v43 = vpop.permute.xlu1 %294 }
 0x10e   : > { %v746_v15 = vsel %vm744_vm9, %v745_v0, %v1562_v26  ;;  %v509_v58 = vsub.s32 32, %v508_v52  ;;  %v513_v16 = vsub.s32 4294967266, %v508_v52  ;;  %vm760_vm4 = vcmp.gt.s32.totalorder %v759_v14, 0 }
 0x10f   : > { %v743_v53 = vsel %vm741_vm11, %v1560_v2, %v742_v9  ;;  %v510_v24 = vshll.u32 %v2121_v6, %v508_v52  ;;  %v908_v23 = vmul.u32 %v2131_v8, %v892_v25  ;;  %vm910_vm5 = vc.u32 %v2162_v49, %v2156_v45 }
 0x110   : > { %v747_v22 = vsel %vm740_vm15, %v743_v53, %v746_v15  ;;  %v511_v27 = vshrl.u32 %v493_v13, %v509_v58  ;;  %v514_v31 = vadd.s32 127, %v513_v16  ;;  %v761_v29 = vsel %vm760_vm4, %v759_v14, 0 }
 0x111   : > { %v748_v4 = vsel %vm737_vm0, nan, %v747_v22  ;;  %v912_v42 = vsel %vm910_vm5, %v911_v62, %v2157_v60  ;;  %vm2190_vm6 = vcmp.le.f32.partialorder %v437_v48, 0.7853982  ;;  %v763_v13 = vand.u32 31, %v761_v29 }
 0x112   : > { %1272 = vst [vmem:[%s2061_s11 + $0x18] sm:$0xff] %v748_v4  ;;  %v512_v33 = vor.u32 %v511_v27, %v510_v24  ;;  %v515_v35 = vshll.u32 %v514_v31, 23  ;;  %v913_v38 = vadd.s32 %v912_v42, %v908_v23  ;;  %v526_v8 = vsel %vm2190_vm6, 0, %v524_v36 }
 0x113   : > { %v757_v54 = vor.u32 8388608, %v2166_v11  ;;  %v315_v17 = vmul.f32 %v1766_v19, %v295_v43  ;;  %v762_v40 = vshrl.u32 %v761_v29, 5  ;;  %v764_v41 = vsub.s32 32, %v763_v13 }
 0x114   : > { %v516_v39 = vor.u32 4788187, %v515_v35  ;;  %v519_v28 = vcvt.s32.f32 %v512_v33  ;;  %v914_v34 = vadd.s32 536870912, %v913_v38  ;;  %v766_v48 = vshll.u32 %v1670_v57, %v763_v13 }
 0x115   : > { %v769_v44 = vshll.u32 %v1671_v59, %v763_v13  ;;  %v772_v3 = vshll.u32 %v1672_v61, %v763_v13  ;;  %v767_v21 = vshrl.u32 %v1671_v59, %v764_v41  ;;  %v770_v55 = vshrl.u32 %v1672_v61, %v764_v41 }
 0x116   : > { %v517_v12 = vand.u32 2147483647, %v516_v39  ;;  %v915_v46 = vshrl.u32 %v914_v34, 30  ;;  %v775_v51 = vshll.u32 %v1673_v63, %v763_v13  ;;  %v773_v30 = vshrl.u32 %v1673_v63, %v764_v41 }
 0x117   : > { %v776_v47 = vshrl.u32 %v1674_v1, %v764_v41  ;;  %v779_v60 = vshrl.u32 %v1675_v10, %v764_v41  ;;  %v768_v0 = vor.u32 %v767_v21, %v766_v48  ;;  %v778_v5 = vshll.u32 %v1674_v1, %v763_v13 }
 0x118   : > { %v520_v2 = vmul.f32 %v519_v28, %v517_v12  ;;  %v916_v26 = vshll.u32 %v915_v46, 30  ;;  %v2209_v9 = vmul.f32 %v1766_v19, %v290_v56  ;;  %vm855_vm7 = vcmp.lt.s32.totalorder %v1986_v7, 0 }
 0x119   : > { %v771_v11 = vor.u32 %v770_v55, %v769_v44  ;;  %v774_v14 = vor.u32 %v773_v30, %v772_v3  ;;  %v777_v15 = vor.u32 %v776_v47, %v775_v51  ;;  %v530_v58 = vadd.s32 3, %v526_v8 }
 0x11a   : > { %v521_v52 = vxor.u32 2147483648, %v520_v2  ;;  %v2212_v16 = vsub.s32 %v913_v38, %v916_v26  ;;  %vm781_vm8 = vcmp.lt.s32.totalorder %v762_v40, 1  ;;  %v2215_v25 = vadd.f32 %v1771_v20, %v315_v17 }
 0x11b   : > { %v765_v36 = vshrl.u32 %v1670_v57, %v764_v41  ;;  %v780_v19 = vor.u32 %v779_v60, %v778_v5  ;;  %vm782_vm10 = vcmp.lt.s32.totalorder %v762_v40, 2  ;;  %vm783_vm9 = vcmp.lt.s32.totalorder %v762_v40, 3 }
 0x11c   : > { %v522_v53 = vsel %vm439_vm12, %v521_v52, %v520_v2  ;;  %v919_v22 = vsub.s32 0, %v2212_v16  ;;  %vm784_vm11 = vcmp.lt.s32.totalorder %v762_v40, 4  ;;  %vm2226_vm13 = vcmp.le.f32.partialorder %v853_v18, 0.7853982 }
 0x11d   : > { %v525_v62 = vsel %vm2190_vm6, %v1876_v37, %v522_v53  ;;  %v786_v24 = vsel %vm784_vm11, %v774_v14, 2102212464  ;;  %v789_v27 = vsel %vm781_vm8, %v768_v0, %v771_v11  ;;  %v790_v31 = vsel %vm784_vm11, %v777_v15, 920167782 }
 0x11e   : > { %1563 = vcosq.f32 %v525_v62  ;;  %v1426_v4 = vmin.u32 %v919_v22, %v2212_v16  ;;  %v939_v23 = vsub.s32 4, %v915_v46  ;;  %v791_v29 = vsel %vm783_vm9, %v774_v14, %v790_v31 }
 0x11f   : > { %1565 = vsinq.f32 %v525_v62  ;;  %v792_v43 = vsel %vm782_vm10, %v789_v27, %v791_v29  ;;  %v793_v33 = vsel %vm781_vm8, %v771_v11, %v774_v14  ;;  %v794_v35 = vsel %vm784_vm11, %v780_v19, 1326507024 }
 0x120   : > { %v797_v42 = vshll.u32 %v757_v54, 8  ;;  %v531_v18 = vand.u32 3, %v530_v58  ;;  %v921_v6 = vclz %v1426_v4  ;;  %v785_v38 = vsel %vm781_vm8, %v765_v36, %v768_v0 }
 0x121   : > { %v787_v13 = vsel %vm783_vm9, %v771_v11, %v786_v24  ;;  %v795_v39 = vsel %vm783_vm9, %v777_v15, %v794_v35  ;;  %v1064_v28 = vand.u32 2139095040, %v2215_v25  ;;  %v940_v41 = vsel %vm855_vm7, %v939_v23, %v915_v46 }
 0x122   : > { %v2238_v8 = vmul.u32.u64.low %v797_v42, %v792_v43  ;;  %v2239_v17 = vmul.u32.u64.high %v797_v42, %v792_v43, %v2238_v8  ;;  %v1427_v34 = vadd.s32 4294967294, %v921_v6  ;;  %v796_v54 = vsel %vm782_vm10, %v793_v33, %v795_v39 }
 0x123   : > { %v1061_v12 = vand.u32 2147483647, %v2215_v25  ;;  %v788_v48 = vsel %vm782_vm10, %v785_v38, %v787_v13  ;;  %v2248_v44 = vmul.u32.u64.low %v797_v42, %v796_v54  ;;  %v2249_v3 = vmul.u32.u64.high %v797_v42, %v796_v54, %v2248_v44  ;;  %v2272_v38 = vld [vmem:[%s2542_s2] ss:$0 sm:$0xff] }
 0x124   : > { %v1065_v56 = vshrl.u32 %v1064_v28, 23  ;;  %vm532_vm12 = vcmp.lt.s32.totalorder %v531_v18, 2  ;;  %vm533_vm14 = vcmp.eq.s32.totalorder %v531_v18, 0  ;;  %vm536_vm15 = vcmp.eq.s32.totalorder %v531_v18, 2 }
 0x125   : > { %vm1428_vm0 = vcmp.lt.s32.totalorder %v1427_v34, 0  ;;  %v909_v21 = vadd.s32 %v2156_v45, %v2162_v49  ;;  %v807_v46 = vadd.s32 1, %v2239_v17  ;;  %v942_v40 = vsel %vm2226_vm13, 0, %v940_v41 }
 0x126   : > { %v924_v55 = vsel %vm1428_vm0, 0, %v1427_v34  ;;  %v1433_v51 = vadd.s32 4294967169, %v1065_v56  ;;  %v804_v47 = vmul.u32 %v797_v42, %v788_v48  ;;  %vm806_vm1 = vc.u32 %v2249_v3, %v2238_v8 }
 0x127   : > { %v925_v2 = vsub.s32 32, %v924_v55  ;;  %v929_v30 = vsub.s32 4294967266, %v924_v55  ;;  %v926_v26 = vshll.u32 %v2212_v16, %v924_v55  ;;  %v1068_v0 = vand.u32 8388607, %v1061_v12 }
 0x128   : > { %v1564_v60 = vpop.eup %1563  ;;  %v1071_v45 = vadd.s32 1, %v1433_v51  ;;  %v808_v14 = vsel %vm806_vm1, %v807_v46, %v2239_v17  ;;  %v946_v58 = vadd.s32 3, %v942_v40  ;;  %vm529_vm3 = vweird.f32 %v1876_v37 }
 0x129   : > { %v1566_v49 = vpop.eup %1565  ;;  %v537_v5 = vxor.u32 2147483648, %v1564_v60  ;;  %v927_v52 = vshrl.u32 %v909_v21, %v925_v2  ;;  %v930_v11 = vadd.s32 127, %v929_v30  ;;  %v809_v53 = vadd.s32 %v808_v14, %v804_v47 }
 0x12a   : > { %v534_v15 = vxor.u32 2147483648, %v1566_v49  ;;  %vm1072_vm2 = vcmp.gt.s32.totalorder %v1071_v45, 0  ;;  %v1069_v27 = vor.u32 8388608, %v1068_v0  ;;  %v2267_v6 = vand.u32 3, %v946_v58 }
 0x12b   : > { %v538_v16 = vsel %vm536_vm15, %v537_v5, %v1566_v49  ;;  %v928_v36 = vor.u32 %v927_v52, %v926_v26  ;;  %v931_v19 = vshll.u32 %v930_v11, 23  ;;  %v1073_v62 = vsel %vm1072_vm2, %v1071_v45, 0 }
 0x12c   : > { %v535_v22 = vsel %vm533_vm14, %v1564_v60, %v534_v15  ;;  %v810_v24 = vadd.s32 536870912, %v809_v53  ;;  %v1075_v31 = vand.u32 31, %v1073_v62  ;;  %v2276_v13 = vadd.f32 %v2272_v38, %v2209_v9 }
 0x12d   : > { %v539_v4 = vsel %vm532_vm12, %v535_v22, %v538_v16  ;;  %v932_v23 = vor.u32 4788187, %v931_v19  ;;  %v935_v42 = vcvt.s32.f32 %v928_v36  ;;  %v2280_v17 = vshll.u32 %v1069_v27, 8 }
 0x12e   : > { %v540_v29 = vsel %vm529_vm3, nan, %v539_v4  ;;  %v811_v43 = vshrl.u32 %v810_v24, 30  ;;  %v1076_v33 = vsub.s32 32, %v1075_v31  ;;  %v1078_v18 = vshll.u32 %v1670_v57, %v1075_v31 }
 0x12f   : > { %1270 = vst [vmem:[%s2061_s11 + $0x8] sm:$0xff] %v540_v29  ;;  %v933_v35 = vand.u32 2147483647, %v932_v23  ;;  %v805_v48 = vadd.s32 %v2238_v8, %v2249_v3  ;;  %v1074_v9 = vshrl.u32 %v1073_v62, 5  ;;  %v1081_v56 = vshll.u32 %v1671_v59, %v1075_v31 }
 0x130   : > { %v812_v37 = vshll.u32 %v811_v43, 30  ;;  %v1079_v39 = vshrl.u32 %v1671_v59, %v1076_v33  ;;  %v1082_v34 = vshrl.u32 %v1672_v61, %v1076_v33  ;;  %v1085_v41 = vshrl.u32 %v1673_v63, %v1076_v33 }
 0x131   : > { %v936_v28 = vmul.f32 %v935_v42, %v933_v35  ;;  %v1088_v54 = vshrl.u32 %v1674_v1, %v1076_v33  ;;  %v1084_v46 = vshll.u32 %v1672_v61, %v1075_v31  ;;  %v1087_v51 = vshll.u32 %v1673_v63, %v1075_v31 }
 0x132   : > { %v2287_v44 = vsub.s32 %v809_v53, %v812_v37  ;;  %v1080_v55 = vor.u32 %v1079_v39, %v1078_v18  ;;  %vm751_vm4 = vcmp.lt.s32.totalorder %v2100_v50, 0  ;;  %v1083_v30 = vor.u32 %v1082_v34, %v1081_v56 }
 0x133   : > { %v937_v21 = vxor.u32 2147483648, %v936_v28  ;;  %v1090_v40 = vshll.u32 %v1674_v1, %v1075_v31  ;;  %v1091_v8 = vshrl.u32 %v1675_v10, %v1076_v33  ;;  %v1086_v47 = vor.u32 %v1085_v41, %v1084_v46 }
 0x134   : > { %v815_v2 = vsub.s32 0, %v2287_v44  ;;  %v1089_v60 = vor.u32 %v1088_v54, %v1087_v51  ;;  %v960_v26 = vand.u32 2139095040, %v2276_v13  ;;  %v835_v49 = vsub.s32 4, %v811_v43 }
 0x135   : > { %v938_v3 = vsel %vm855_vm7, %v937_v21, %v936_v28  ;;  %v1092_v5 = vor.u32 %v1091_v8, %v1090_v40  ;;  %v1077_v52 = vshrl.u32 %v1670_v57, %v1076_v33  ;;  %vm1093_vm5 = vcmp.lt.s32.totalorder %v1074_v9, 1 }
 0x136   : > { %v941_v0 = vsel %vm2226_vm13, %v1986_v7, %v938_v3  ;;  %v1422_v45 = vmin.u32 %v815_v2, %v2287_v44  ;;  %vm1094_vm6 = vcmp.lt.s32.totalorder %v1074_v9, 2  ;;  %vm1096_vm7 = vcmp.lt.s32.totalorder %v1074_v9, 4 }
 0x137   : > { %1567 = vcosq.f32 %v941_v0  ;;  %v1101_v14 = vsel %vm1093_vm5, %v1080_v55, %v1083_v30  ;;  %vm1095_vm8 = vcmp.lt.s32.totalorder %v1074_v9, 3  ;;  %v1098_v15 = vsel %vm1096_vm7, %v1086_v47, 2102212464 }
 0x138   : > { %1569 = vsinq.f32 %v941_v0  ;;  %v817_v11 = vclz %v1422_v45  ;;  %v1102_v58 = vsel %vm1096_vm7, %v1089_v60, 920167782  ;;  %v1105_v53 = vsel %vm1093_vm5, %v1083_v30, %v1086_v47 }
 0x139   : > { %v1097_v20 = vsel %vm1093_vm5, %v1077_v52, %v1080_v55  ;;  %v1103_v36 = vsel %vm1095_vm8, %v1086_v47, %v1102_v58  ;;  %v1106_v19 = vsel %vm1096_vm7, %v1092_v5, 1326507024  ;;  %v1099_v62 = vsel %vm1095_vm8, %v1083_v30, %v1098_v15  ;;  %v300_v30 = vpop.permute.xlu0 %299  ;;  %v1588_v5 = vld [vmem:[%s2541_s1] ss:$0 sm:$0xff] }
 0x13a   : > { %v1423_v16 = vadd.s32 4294967294, %v817_v11  ;;  %v1104_v22 = vsel %vm1094_vm6, %v1101_v14, %v1103_v36  ;;  %v1107_v24 = vsel %vm1095_vm8, %v1089_v60, %v1106_v19  ;;  %v961_v27 = vshrl.u32 %v960_v26, 23 }
 0x13b   : > { %v1108_v31 = vsel %vm1094_vm6, %v1105_v53, %v1107_v24  ;;  %v2307_v4 = vmul.u32.u64.low %v2280_v17, %v1104_v22  ;;  %v2308_v23 = vmul.u32.u64.high %v2280_v17, %v1104_v22, %v2307_v4  ;;  %v836_v33 = vsel %vm751_vm4, %v835_v49, %v811_v43 }
 0x13c   : > { %vm1424_vm10 = vcmp.lt.s32.totalorder %v1423_v16, 0  ;;  %v2314_v35 = vmul.u32.u64.low %v2280_v17, %v1108_v31  ;;  %v2315_v42 = vmul.u32.u64.high %v2280_v17, %v1108_v31, %v2314_v35  ;;  %v1100_v39 = vsel %vm1094_vm6, %v1097_v20, %v1099_v62 }
 0x13d   : > { %v820_v29 = vsel %vm1424_vm10, 0, %v1423_v16  ;;  %v1429_v28 = vadd.s32 4294967169, %v961_v27  ;;  %vm948_vm9 = vcmp.lt.s32.totalorder %v2267_v6, 2  ;;  %vm949_vm11 = vcmp.eq.s32.totalorder %v2267_v6, 0 }
 0x13e   : > { %v821_v37 = vsub.s32 32, %v820_v29  ;;  %v825_v18 = vsub.s32 4294967266, %v820_v29  ;;  %vm2322_vm13 = vcmp.le.f32.partialorder %v749_v32, 0.7853982  ;;  %v822_v43 = vshll.u32 %v2287_v44, %v820_v29 }
 0x13f   : > { %v1119_v56 = vadd.s32 1, %v2308_v23  ;;  %v967_v21 = vadd.s32 1, %v1429_v28  ;;  %vm952_vm12 = vcmp.eq.s32.totalorder %v2267_v6, 2  ;;  %v838_v55 = vsel %vm2322_vm13, 0, %v836_v33 }
 0x140   : > { %v823_v41 = vshrl.u32 %v805_v48, %v821_v37  ;;  %v826_v54 = vadd.s32 127, %v825_v18  ;;  %v1116_v46 = vmul.u32 %v2280_v17, %v1100_v39  ;;  %vm1118_vm14 = vc.u32 %v2315_v42, %v2307_v4 }
 0x141   : > { %v1568_v9 = vpop.eup %1567  ;;  %v1120_v48 = vsel %vm1118_vm14, %v1119_v56, %v2308_v23  ;;  %v957_v3 = vand.u32 2147483647, %v2276_v13  ;;  %vm968_vm15 = vcmp.gt.s32.totalorder %v967_v21, 0  ;;  %v842_v26 = vadd.s32 3, %v838_v55 }
 0x142   : > { %v1570_v32 = vpop.eup %1569  ;;  %v953_v51 = vxor.u32 2147483648, %v1568_v9  ;;  %v824_v2 = vor.u32 %v823_v41, %v822_v43  ;;  %v827_v44 = vshll.u32 %v826_v54, 23  ;;  %v1121_v8 = vadd.s32 %v1120_v48, %v1116_v46 }
 0x143   : > { %v950_v40 = vxor.u32 2147483648, %v1570_v32  ;;  %v969_v17 = vsel %vm968_vm15, %v967_v21, 0  ;;  %v316_v52 = vmul.f32 %v1588_v5, %v300_v30  ;;  %vm945_vm0 = vweird.f32 %v1986_v7 }
 0x144   : > { %v954_v47 = vsel %vm952_vm12, %v953_v51, %v1570_v32  ;;  %v828_v60 = vor.u32 4788187, %v827_v44  ;;  %v1122_v45 = vadd.s32 536870912, %v1121_v8  ;;  %v971_v49 = vand.u32 31, %v969_v17 }
 0x145   : > { %v951_v0 = vsel %vm949_vm11, %v1568_v9, %v950_v40  ;;  %v831_v15 = vcvt.s32.f32 %v824_v2  ;;  %v964_v16 = vand.u32 8388607, %v957_v3  ;;  %v2349_v19 = vand.u32 3, %v842_v26 }
 0x146   : > { %v955_v11 = vsel %vm948_vm9, %v951_v0, %v954_v47  ;;  %v829_v14 = vand.u32 2147483647, %v828_v60  ;;  %v2344_v53 = vshrl.u32 %v1122_v45, 30  ;;  %v972_v20 = vsub.s32 32, %v971_v49 }
 0x147   : > { %v956_v58 = vsel %vm945_vm0, nan, %v955_v11  ;;  %v974_v7 = vshll.u32 %v1670_v57, %v971_v49  ;;  %v2355_v22 = vadd.f32 %v2272_v38, %v316_v52  ;;  %v965_v33 = vor.u32 8388608, %v964_v16 }
 0x148   : > { %1274 = vst [vmem:[%s2061_s11 + $0x28] sm:$0xff] %v956_v58  ;;  %v832_v36 = vmul.f32 %v831_v15, %v829_v14  ;;  %v1124_v62 = vshll.u32 %v2344_v53, 30  ;;  %v975_v6 = vshrl.u32 %v1671_v59, %v972_v20  ;;  %v978_v27 = vshrl.u32 %v1672_v61, %v972_v20 }
 0x149   : > { %v981_v31 = vshrl.u32 %v1673_v63, %v972_v20  ;;  %v984_v23 = vshrl.u32 %v1674_v1, %v972_v20  ;;  %v970_v35 = vshrl.u32 %v969_v17, 5  ;;  %v977_v37 = vshll.u32 %v1671_v59, %v971_v49 }
 0x14a   : > { %v833_v24 = vxor.u32 2147483648, %v832_v36  ;;  %v2360_v29 = vsub.s32 %v1121_v8, %v1124_v62  ;;  %v976_v39 = vor.u32 %v975_v6, %v974_v7  ;;  %v980_v38 = vshll.u32 %v1672_v61, %v971_v49 }
 0x14b   : > { %v983_v28 = vshll.u32 %v1673_v63, %v971_v49  ;;  %v979_v54 = vor.u32 %v978_v27, %v977_v37  ;;  %v986_v56 = vshll.u32 %v1674_v1, %v971_v49  ;;  %v987_v55 = vshrl.u32 %v1675_v10, %v972_v20 }
 0x14c   : > { %v834_v18 = vsel %vm751_vm4, %v833_v24, %v832_v36  ;;  %v1127_v41 = vsub.s32 0, %v2360_v29  ;;  %v982_v21 = vor.u32 %v981_v31, %v980_v38  ;;  %vm1063_vm1 = vcmp.lt.s32.totalorder %v2215_v25, 0 }
 0x14d   : > { %v837_v43 = vsel %vm2322_vm13, %v2100_v50, %v834_v18  ;;  %v985_v9 = vor.u32 %v984_v23, %v983_v28  ;;  %v1147_v32 = vsub.s32 4, %v2344_v53  ;;  %v1005_v51 = vshll.u32 %v965_v33, 8 }
 0x14e   : > { %1571 = vcosq.f32 %v837_v43  ;;  %v1434_v46 = vmin.u32 %v1127_v41, %v2360_v29  ;;  %v973_v34 = vshrl.u32 %v1670_v57, %v972_v20  ;;  %v988_v2 = vor.u32 %v987_v55, %v986_v56 }
 0x14f   : > { %1573 = vsinq.f32 %v837_v43  ;;  %vm989_vm2 = vcmp.lt.s32.totalorder %v970_v35, 1  ;;  %vm990_vm3 = vcmp.lt.s32.totalorder %v970_v35, 2  ;;  %vm991_vm4 = vcmp.lt.s32.totalorder %v970_v35, 3 }
 0x150   : > { %v1129_v44 = vclz %v1434_v46  ;;  %vm992_vm5 = vcmp.lt.s32.totalorder %v970_v35, 4  ;;  %v997_v48 = vsel %vm989_vm2, %v976_v39, %v979_v54  ;;  %v1001_v8 = vsel %vm989_vm2, %v979_v54, %v982_v21 }
 0x151   : > { %v994_v30 = vsel %vm992_vm5, %v982_v21, 2102212464  ;;  %v998_v40 = vsel %vm992_vm5, %v985_v9, 920167782  ;;  %v1002_v47 = vsel %vm992_vm5, %v988_v2, 1326507024  ;;  %v993_v26 = vsel %vm989_vm2, %v973_v34, %v976_v39 }
 0x152   : > { %v1435_v60 = vadd.s32 4294967294, %v1129_v44  ;;  %v999_v17 = vsel %vm991_vm4, %v982_v21, %v998_v40  ;;  %v1003_v0 = vsel %vm991_vm4, %v985_v9, %v1002_v47  ;;  %v995_v45 = vsel %vm991_vm4, %v979_v54, %v994_v30 }
 0x153   : > { %v1000_v49 = vsel %vm990_vm3, %v997_v48, %v999_v17  ;;  %v1004_v5 = vsel %vm990_vm3, %v1001_v8, %v1003_v0  ;;  %v1168_v52 = vand.u32 2139095040, %v2355_v22  ;;  %vm845_vm6 = vcmp.eq.s32.totalorder %v2349_v19, 0 }
 0x154   : > { %vm1436_vm7 = vcmp.lt.s32.totalorder %v1435_v60, 0  ;;  %v2381_v11 = vmul.u32.u64.low %v1005_v51, %v1004_v5  ;;  %v2382_v14 = vmul.u32.u64.high %v1005_v51, %v1004_v5, %v2381_v11  ;;  %v1117_v36 = vadd.s32 %v2307_v4, %v2315_v42 }
 0x155   : > { %v1132_v15 = vsel %vm1436_vm7, 0, %v1435_v60  ;;  %v2384_v58 = vmul.u32.u64.low %v1005_v51, %v1000_v49  ;;  %v2385_v16 = vmul.u32.u64.high %v1005_v51, %v1000_v49, %v2384_v58  ;;  %v1169_v20 = vshrl.u32 %v1168_v52, 23 }
 0x156   : > { %v1133_v62 = vsub.s32 32, %v1132_v15  ;;  %v1137_v7 = vsub.s32 4294967266, %v1132_v15  ;;  %v996_v6 = vsel %vm990_vm3, %v993_v26, %v995_v45  ;;  %vm848_vm8 = vcmp.eq.s32.totalorder %v2349_v19, 2 }
 0x157   : > { %v1148_v27 = vsel %vm1063_vm1, %v1147_v32, %v2344_v53  ;;  %v1165_v31 = vand.u32 2147483647, %v2355_v22  ;;  %v1437_v23 = vadd.s32 4294967169, %v1169_v20  ;;  %v1134_v18 = vshll.u32 %v2360_v29, %v1132_v15 }
 0x158   : > { %v1572_v24 = vpop.eup %1571  ;;  %v1135_v39 = vshrl.u32 %v1117_v36, %v1133_v62  ;;  %v1138_v4 = vadd.s32 127, %v1137_v7  ;;  %v1012_v38 = vmul.u32 %v1005_v51, %v996_v6  ;;  %vm1014_vm10 = vc.u32 %v2382_v14, %v2384_v58 }
 0x159   : > { %v1574_v33 = vpop.eup %1573  ;;  %v849_v37 = vxor.u32 2147483648, %v1572_v24  ;;  %v1015_v35 = vadd.s32 1, %v2385_v16  ;;  %v1175_v41 = vadd.s32 1, %v1437_v23  ;;  %vm841_vm9 = vweird.f32 %v2100_v50 }
 0x15a   : > { %v846_v42 = vxor.u32 2147483648, %v1574_v33  ;;  %v1136_v43 = vor.u32 %v1135_v39, %v1134_v18  ;;  %v1139_v53 = vshll.u32 %v1138_v4, 23  ;;  %vm844_vm11 = vcmp.lt.s32.totalorder %v2349_v19, 2 }
 0x15b   : > { %v850_v28 = vsel %vm848_vm8, %v849_v37, %v1574_v33  ;;  %v1016_v54 = vsel %vm1014_vm10, %v1015_v35, %v2385_v16  ;;  %vm2407_vm13 = vcmp.le.f32.partialorder %v1061_v12, 0.7853982  ;;  %v1172_v32 = vand.u32 8388607, %v1165_v31 }
 0x15c   : > { %v847_v29 = vsel %vm845_vm6, %v1572_v24, %v846_v42  ;;  %v1140_v9 = vor.u32 4788187, %v1139_v53  ;;  %v1017_v55 = vadd.s32 %v1016_v54, %v1012_v38  ;;  %v1150_v50 = vsel %vm2407_vm13, 0, %v1148_v27 }
 0x15d   : > { %v851_v56 = vsel %vm844_vm11, %v847_v29, %v850_v28  ;;  %vm1176_vm12 = vcmp.gt.s32.totalorder %v1175_v41, 0  ;;  %v1143_v51 = vcvt.s32.f32 %v1136_v43  ;;  %v1154_v30 = vadd.s32 3, %v1150_v50 }
 0x15e   : > { %v852_v46 = vsel %vm841_vm9, nan, %v851_v56  ;;  %v1141_v19 = vand.u32 2147483647, %v1140_v9  ;;  %v1018_v34 = vadd.s32 536870912, %v1017_v55  ;;  %v1177_v2 = vsel %vm1176_vm12, %v1175_v41, 0 }
 0x15f   : > { %1273 = vst [vmem:[%s2061_s11 + $0x20] sm:$0xff] %v852_v46  ;;  %v1179_v44 = vand.u32 31, %v1177_v2  ;;  %v1173_v60 = vor.u32 8388608, %v1172_v32  ;;  %v1178_v20 = vshrl.u32 %v1177_v2, 5  ;;  %v1155_v33 = vand.u32 3, %v1154_v30 }
 0x160   : > { %v1144_v12 = vmul.f32 %v1143_v51, %v1141_v19  ;;  %v2416_v48 = vshrl.u32 %v1018_v34, 30  ;;  %v1013_v50 = vadd.s32 %v2384_v58, %v2382_v14  ;;  %vm1153_vm7 = vweird.f32 %v2215_v25 }
 0x161   : > { %v1180_v40 = vsub.s32 32, %v1179_v44  ;;  %v1182_v26 = vshll.u32 %v1670_v57, %v1179_v44  ;;  %v1185_v0 = vshll.u32 %v1671_v59, %v1179_v44  ;;  %v1188_v11 = vshll.u32 %v1672_v61, %v1179_v44 }
 0x162   : > { %v1145_v8 = vxor.u32 2147483648, %v1144_v12  ;;  %v1020_v47 = vshll.u32 %v2416_v48, 30  ;;  %v1194_v27 = vshll.u32 %v1674_v1, %v1179_v44  ;;  %v1213_v39 = vshll.u32 %v1173_v60, 8 }
 0x163   : > { %v1183_v17 = vshrl.u32 %v1671_v59, %v1180_v40  ;;  %v1186_v45 = vshrl.u32 %v1672_v61, %v1180_v40  ;;  %v1189_v49 = vshrl.u32 %v1673_v63, %v1180_v40  ;;  %v1192_v15 = vshrl.u32 %v1674_v1, %v1180_v40 }
 0x164   : > { %v1146_v5 = vsel %vm1063_vm1, %v1145_v8, %v1144_v12  ;;  %v2426_v52 = vsub.s32 %v1017_v55, %v1020_v47  ;;  %v1191_v59 = vshll.u32 %v1673_v63, %v1179_v44  ;;  %v1195_v61 = vshrl.u32 %v1675_v10, %v1180_v40 }
 0x165   : > { %v1149_v16 = vsel %vm2407_vm13, %v2215_v25, %v1146_v5  ;;  %v1184_v36 = vor.u32 %v1183_v17, %v1182_v26  ;;  %v1187_v7 = vor.u32 %v1186_v45, %v1185_v0  ;;  %v1190_v6 = vor.u32 %v1189_v49, %v1188_v11 }
 0x166   : > { %1575 = vcosq.f32 %v1149_v16  ;;  %v1023_v62 = vsub.s32 0, %v2426_v52  ;;  %v1193_v24 = vor.u32 %v1192_v15, %v1191_v59  ;;  %v1181_v37 = vshrl.u32 %v1670_v57, %v1180_v40 }
 0x167   : > { %1577 = vsinq.f32 %v1149_v16  ;;  %v1196_v18 = vor.u32 %v1195_v61, %v1194_v27  ;;  %vm1197_vm14 = vcmp.lt.s32.totalorder %v1178_v20, 1  ;;  %vm1199_vm15 = vcmp.lt.s32.totalorder %v1178_v20, 3 }
 0x168   : > { %v1430_v23 = vmin.u32 %v1023_v62, %v2426_v52  ;;  %vm1200_vm0 = vcmp.lt.s32.totalorder %v1178_v20, 4  ;;  %v1205_v42 = vsel %vm1197_vm14, %v1184_v36, %v1187_v7  ;;  %v1209_v35 = vsel %vm1197_vm14, %v1187_v7, %v1190_v6 }
 0x169   : > { %v1202_v63 = vsel %vm1200_vm0, %v1190_v6, 2102212464  ;;  %v1206_v38 = vsel %vm1200_vm0, %v1193_v24, 920167782  ;;  %vm1198_vm1 = vcmp.lt.s32.totalorder %v1178_v20, 2  ;;  %v1201_v10 = vsel %vm1197_vm14, %v1181_v37, %v1184_v36 }
 0x16a   : > { %v1025_v4 = vclz %v1430_v23  ;;  %v1207_v1 = vsel %vm1199_vm15, %v1190_v6, %v1206_v38  ;;  %v1210_v43 = vsel %vm1200_vm0, %v1196_v18, 1326507024  ;;  %v1203_v53 = vsel %vm1199_vm15, %v1187_v7, %v1202_v63 }
 0x16b   : > { %v1208_v41 = vsel %vm1198_vm1, %v1205_v42, %v1207_v1  ;;  %v1211_v29 = vsel %vm1199_vm15, %v1193_v24, %v1210_v43  ;;  %v1204_v51 = vsel %vm1198_vm1, %v1201_v10, %v1203_v53  ;;  %vm1156_vm3 = vcmp.lt.s32.totalorder %v1155_v33, 2 }
 0x16c   : > { %v1431_v28 = vadd.s32 4294967294, %v1025_v4  ;;  %v1212_v57 = vsel %vm1198_vm1, %v1209_v35, %v1211_v29  ;;  %v2441_v54 = vmul.u32.u64.low %v1213_v39, %v1208_v41  ;;  %v2442_v56 = vmul.u32.u64.high %v1213_v39, %v1208_v41, %v2441_v54 }
 0x16d   : > { %v2444_v9 = vmul.u32.u64.low %v1213_v39, %v1212_v57  ;;  %v2445_v55 = vmul.u32.u64.high %v1213_v39, %v1212_v57, %v2444_v9  ;;  %vm1160_vm4 = vcmp.eq.s32.totalorder %v1155_v33, 2  ;;  %vm1157_vm5 = vcmp.eq.s32.totalorder %v1155_v33, 0 }
 0x16e   : > { %vm1432_vm2 = vcmp.lt.s32.totalorder %v1431_v28, 0  ;;  %v1223_v8 = vadd.s32 1, %v2442_v56  ;;  %v1220_v60 = vmul.u32 %v1213_v39, %v1204_v51  ;;  %v1043_v36 = vsub.s32 4, %v2416_v48 }
 0x16f   : > { %v1028_v21 = vsel %vm1432_vm2, 0, %v1431_v28  ;;  %vm1222_vm6 = vc.u32 %v2445_v55, %v2441_v54  ;;  %vm959_vm8 = vcmp.lt.s32.totalorder %v2276_v13, 0  ;;  %vm958_vm10 = vcmp.le.f32.partialorder %v957_v3, 0.7853982 }
 0x170   : > { %v1576_v46 = vpop.eup %1575  ;;  %v1029_v32 = vsub.s32 32, %v1028_v21  ;;  %v1033_v19 = vsub.s32 4294967266, %v1028_v21  ;;  %v1030_v44 = vshll.u32 %v2426_v52, %v1028_v21  ;;  %v1224_v17 = vsel %vm1222_vm6, %v1223_v8, %v2442_v56 }
 0x171   : > { %v1578_v34 = vpop.eup %1577  ;;  %v1161_v2 = vxor.u32 2147483648, %v1576_v46  ;;  %v1225_v45 = vadd.s32 %v1224_v17, %v1220_v60  ;;  %v1044_v6 = vsel %vm959_vm8, %v1043_v36, %v2416_v48  ;;  %v1221_v63 = vadd.s32 %v2441_v54, %v2445_v55 }
 0x172   : > { %v1158_v12 = vxor.u32 2147483648, %v1578_v34  ;;  %v1031_v30 = vshrl.u32 %v1013_v50, %v1029_v32  ;;  %v1034_v40 = vadd.s32 127, %v1033_v19  ;;  %v1046_v61 = vsel %vm958_vm10, 0, %v1044_v6 }
 0x173   : > { %v1162_v47 = vsel %vm1160_vm4, %v1161_v2, %v1578_v34  ;;  %v1226_v52 = vadd.s32 536870912, %v1225_v45  ;;  %v1050_v37 = vadd.s32 3, %v1046_v61  ;;  %vm1049_vm14 = vweird.f32 %v2276_v13 }
 0x174   : > { %v1159_v14 = vsel %vm1157_vm5, %v1576_v46, %v1158_v12  ;;  %v1032_v58 = vor.u32 %v1031_v30, %v1030_v44  ;;  %v1035_v26 = vshll.u32 %v1034_v40, 23  ;;  %vm1167_vm15 = vcmp.lt.s32.totalorder %v2355_v22, 0 }
 0x175   : > { %v1163_v0 = vsel %vm1156_vm3, %v1159_v14, %v1162_v47  ;;  %v1227_v16 = vshrl.u32 %v1226_v52, 30  ;;  %v1051_v39 = vand.u32 3, %v1050_v37  ;;  %vm1166_vm0 = vcmp.le.f32.partialorder %v1165_v31, 0.7853982 }
 0x176   : > { %v1164_v49 = vsel %vm1153_vm7, nan, %v1163_v0  ;;  %v1036_v5 = vor.u32 4788187, %v1035_v26  ;;  %v1039_v15 = vcvt.s32.f32 %v1032_v58  ;;  %vm1257_vm4 = vweird.f32 %v2355_v22 }
 0x177   : > { %1276 = vst [vmem:[%s2061_s11 + $0x38] sm:$0xff] %v1164_v49  ;;  %v1228_v59 = vshll.u32 %v1227_v16, 30  ;;  %vm1056_vm11 = vcmp.eq.s32.totalorder %v1051_v39, 2  ;;  %vm1053_vm13 = vcmp.eq.s32.totalorder %v1051_v39, 0  ;;  %vm1052_vm12 = vcmp.lt.s32.totalorder %v1051_v39, 2 }
 0x178   : > { %v1037_v11 = vand.u32 2147483647, %v1036_v5  ;;  %v1251_v50 = vsub.s32 4, %v1227_v16 }
 0x179   : > { %v1229_v7 = vsub.s32 %v1225_v45, %v1228_v59 }
 0x17a   : > { %v1040_v20 = vmul.f32 %v1039_v15, %v1037_v11  ;;  %v1252_v51 = vsel %vm1167_vm15, %v1251_v50, %v1227_v16 }
 0x17b   : > { %v1231_v27 = vsub.s32 0, %v1229_v7 }
 0x17c   : > { %v1041_v62 = vxor.u32 2147483648, %v1040_v20 }
 0x17d   : > { %v1438_v23 = vmin.u32 %v1231_v27, %v1229_v7 }
 0x17e   : > { %v1042_v25 = vsel %vm959_vm8, %v1041_v62, %v1040_v20 }
 0x17f   : > { %v1045_v24 = vsel %vm958_vm10, %v2276_v13, %v1042_v25  ;;  %v1233_v33 = vclz %v1438_v23  ;;  %v1254_v13 = vsel %vm1166_vm0, 0, %v1252_v51 }
 0x180   : > { %1579 = vcosq.f32 %v1045_v24  ;;  %v1258_v2 = vadd.s32 3, %v1254_v13 }
 0x181   : > { %1581 = vsinq.f32 %v1045_v24  ;;  %v1439_v18 = vadd.s32 4294967294, %v1233_v33 }
 0x182   : > { %v1259_v44 = vand.u32 3, %v1258_v2 }
 0x183   : > { %vm1440_vm9 = vcmp.lt.s32.totalorder %v1439_v18, 0 }
 0x184   : > { %v1236_v4 = vsel %vm1440_vm9, 0, %v1439_v18  ;;  %vm1264_vm1 = vcmp.eq.s32.totalorder %v1259_v44, 2  ;;  %vm1261_vm2 = vcmp.eq.s32.totalorder %v1259_v44, 0  ;;  %vm1260_vm3 = vcmp.lt.s32.totalorder %v1259_v44, 2 }
 0x185   : > { %v1237_v42 = vsub.s32 32, %v1236_v4  ;;  %v1241_v3 = vsub.s32 4294967266, %v1236_v4  ;;  %v1238_v28 = vshll.u32 %v1229_v7, %v1236_v4 }
 0x187   : > { %v1239_v1 = vshrl.u32 %v1221_v63, %v1237_v42  ;;  %v1242_v43 = vadd.s32 127, %v1241_v3 }
 0x189   : > { %v1240_v41 = vor.u32 %v1239_v1, %v1238_v28  ;;  %v1243_v29 = vshll.u32 %v1242_v43, 23 }
 0x18a   : > { %v1580_v38 = vpop.eup %1579 }
 0x18b   : > { %v1582_v35 = vpop.eup %1581  ;;  %v1057_v48 = vxor.u32 2147483648, %v1580_v38  ;;  %v1244_v56 = vor.u32 4788187, %v1243_v29  ;;  %v1247_v55 = vcvt.s32.f32 %v1240_v41 }
 0x18c   : > { %v1054_v10 = vxor.u32 2147483648, %v1582_v35 }
 0x18d   : > { %v1058_v53 = vsel %vm1056_vm11, %v1057_v48, %v1582_v35  ;;  %v1245_v9 = vand.u32 2147483647, %v1244_v56 }
 0x18e   : > { %v1055_v57 = vsel %vm1053_vm13, %v1580_v38, %v1054_v10 }
 0x18f   : > { %v1059_v54 = vsel %vm1052_vm12, %v1055_v57, %v1058_v53  ;;  %v1248_v46 = vmul.f32 %v1247_v55, %v1245_v9 }
 0x190   : > { %v1060_v21 = vsel %vm1049_vm14, nan, %v1059_v54 }
 0x191   : > { %1275 = vst [vmem:[%s2061_s11 + $0x30] sm:$0xff] %v1060_v21  ;;  %v1249_v32 = vxor.u32 2147483648, %v1248_v46 }
 0x193   : > { %v1250_v19 = vsel %vm1167_vm15, %v1249_v32, %v1248_v46 }
 0x194   : > { %v1253_v34 = vsel %vm1166_vm0, %v2355_v22, %v1250_v19 }
 0x195   : > { %1583 = vcosq.f32 %v1253_v34 }
 0x196   : > { %1585 = vsinq.f32 %v1253_v34 }
 0x19f   : > { %v1584_v12 = vpop.eup %1583 }
 0x1a0   : > { %v1586_v30 = vpop.eup %1585  ;;  %v1265_v40 = vxor.u32 2147483648, %v1584_v12  ;;  %1285 = sbr.rel (!%p1739_p4) target bundleno = 451 (0x1c3), region = 36 }
 0x1a1   : > { %v1262_v8 = vxor.u32 2147483648, %v1586_v30 }
 0x1a2   : > { %v1266_v47 = vsel %vm1264_vm1, %v1265_v40, %v1586_v30 }
 0x1a3   : > { %v1263_v31 = vsel %vm1261_vm2, %v1584_v12, %v1262_v8 }
 0x1a4   : > { %v1267_v60 = vsel %vm1260_vm3, %v1263_v31, %v1266_v47 }
 0x1a5   : > { %v1268_v14 = vsel %vm1257_vm4, nan, %v1267_v60 }
 0x1a6   : > { %1277 = vst [vmem:[%s2061_s11 + $0x40] sm:$0xff] %v1268_v14 }
 0x1a7   : > { %s2568_s28 = smov (!%p1288_p12, %s1287_s28), 9 }
 0x1a8   : > { %s2479_s29 = sshll.u32 %s2568_s28, 7 }
 0x1a9   : > { %s1292_s30 = ssub.s32 1152, %s2479_s29 }
 0x1aa   : > { %1293 = vsyncadd %s2474_s27, %s1292_s30  ;;  %p1442_p13 = scmp.ne.s32.totalorder %s2479_s29, 0  ;;  %s1448_s4 = smul.u32 1152, %s1659_s15 }
 0x1ab   : > { %s1299_s5 = sshll.u32 %s2061_s11, 4  ;;  %s1676_s8 = smov [#allocation2]   ;;  %s2491_s5 = int_to_ptr.vmem [resolvable:$true] %s1299_s5 }
 0x1ac   : > { %s2489_s7 = scalar_lea.hbm %s2543_s3, %s1448_s4  ;;  %s1589_s26 = scalar_lea.vmem %s2491_s5, %s2479_s29 }
 0x1ad   : > { %p1590_p0 = scmp.ne.s32.totalorder %s2491_s5, %s1589_s26  ;;  %s1593_s9 = sshll.u32 %s1676_s8, 4  ;;  %s1594_s9 = int_to_ptr.vmem [resolvable:$false] %s1593_s9 }
 0x1ae   : > { %s1595_s15 = scalar_lea.vmem %s1594_s9, 2304  ;;  %p1596_p3 = scmp.lt.s32.totalorder %s2491_s5, %s1594_s9 }
 0x1af   : > { %p1591_p1 = pnand %p1590_p0, %p1442_p13  ;;  %p1597_p4 = scmp.lt.s32.totalorder %s1595_s15, %s1589_s26 }
 0x1b1   : > { %p1592_p2 = pneg %p1591_p1  ;;  %p1598_p5 = por %p1597_p4, %p1596_p3 }
 0x1b3   : > { %p1599_p6 = pnand %p1598_p5, %p1592_p2 }
 0x1b5   : > { %1602 = shalt.err (!%p1599_p6)
}
 0x1b6   : > { %s1603_s10 = scalar_lea.hbm %s2489_s7, %s2479_s29  ;;  %s1607_s19 = scalar_lea.hbm %s2543_s3, 2176 }
 0x1b7   : > { %p1604_p7 = scmp.ne.s32.totalorder %s2489_s7, %s1603_s10  ;;  %p1608_p11 = scmp.lt.u32.totalorder %s2489_s7, %s2543_s3 }
 0x1b8   : > { %p1609_p12 = scmp.lt.u32.totalorder %s1607_s19, %s1603_s10  ;;  %p1611_p1 = scmp.lt.u32.totalorder %s1603_s10, %s2489_s7 }
 0x1b9   : > { %p1605_p9 = pnand %p1604_p7, %p1442_p13 }
 0x1ba   : > { %p1610_p0 = por %p1609_p12, %p1608_p11 }
 0x1bb   : > { %p1606_p10 = pneg %p1605_p9 }
 0x1bc   : > { %p1612_p2 = por %p1611_p1, %p1610_p0 }
 0x1be   : > { %p1613_p3 = pnand %p1612_p2, %p1606_p10 }
 0x1c0   : > { %1616 = shalt.err (!%p1613_p3)
}
 0x1c1   : > { %s1677_s28 = smov 128   ;;  %s1678_s30 = smov 8  }
 0x1c2   : > { %1305 = dma.vmem_to_hbm [thread:$0]  (%p1442_p13), %s2491_s5, %s2479_s29, %s2489_s7, %s2474_s27, %s1677_s28, %s1677_s28, %s1678_s30  }
 0x1c3 PF: > { %p1491_p4 = scmp.ge.s32.totalorder %s1667_s17, 2  ;;  %s1314_s4 = sand.u32 1, %s1647_s12  }
 0x1c4   : > { %s1315_s22 = scalar_lea.sflag [#allocation3], %s1314_s4 }
 0x1c5   : > { %p1488_p5 = pnand %p1491_p4, %p1746_p8 }
 0x1c7   : > { %1642 = dma.done.wait (!%p1488_p5), %s1315_s22, 1152  }
 0x1c8   : > { %1644 = vsyncadd (!%p1488_p5), %s1315_s22, 4294966144  ;;  %s16_s17 = sadd.s32 1, %s1667_s17   ;;  %s2560_s12 = smov %s1651_s13 }
 0x1c9   : > { %p13_p6 = scmp.ge.s32.totalorder %s16_s17, 4   ;;  %s2561_s13 = smov %s1655_s14 }
 0x1ca   : > { %s2562_s14 = smov %s1752_s25  ;;  %s2563_s15 = smov %s1663_s16 }
 0x1cb   : > { %s2564_s16 = smov %s2566_s20  ;;  %15 = sbr.rel (!%p13_p6) target bundleno = 4 (0x4), region = 73 }
 0x1d2   :  { %1320 = vsyncpa [#allocation3], 1 }
 0x1d3   :  { %1322 = vsyncpa [#allocation3 + $0x1], 1 }

</bundles_post_ra>
